<compile_context>
chip_gen: v6e
topology: v6e:2x2x1
jax: 0.10.0
libtpu: 0.0.40
codegen_flags: <defaults>
</compile_context>

<pallas_src>
import math
from functools import partial

import jax
import jax.numpy as jnp
from jax.experimental import pallas as pl
from jax.experimental.pallas import tpu as pltpu


def _mha_kernel(q_ref, k_ref, v_ref, m_ref,
                wq_ref, wk_ref, wv_ref, wo_ref, bo_ref,
                o_ref, cat_ref, *, num_heads, head_dim, scale):
    TB, Sq, E = q_ref.shape
    Sk = k_ref.shape[1]

    # Shared-across-heads projections as one lane-dense (E,E) matmul each (block-diag).
    q2 = q_ref[...].reshape(TB * Sq, E)
    k2 = k_ref[...].reshape(TB * Sk, E)
    v2 = v_ref[...].reshape(TB * Sk, E)
    qp = jnp.dot(q2, wq_ref[...], preferred_element_type=jnp.float32).reshape(TB, Sq, E)
    kp = jnp.dot(k2, wk_ref[...], preferred_element_type=jnp.float32).reshape(TB, Sk, E)
    vp = jnp.dot(v2, wv_ref[...], preferred_element_type=jnp.float32).reshape(TB, Sk, E)

    keep = m_ref[...] > 0.0                       # (TB, Sq, Sk), shared by all heads

    # Per-head scaled dot-product attention (statically unrolled; H known at trace time).
    for h in range(num_heads):
        sl = slice(h * head_dim, (h + 1) * head_dim)
        qh = qp[:, :, sl]                         # (TB, Sq, D)
        kh = kp[:, :, sl]                         # (TB, Sk, D)
        vh = vp[:, :, sl]                         # (TB, Sk, D)

        e = jnp.einsum('bqd,bkd->bqk', qh, kh,
                       preferred_element_type=jnp.float32)      # (TB, Sq, Sk)
        e = jnp.where(keep, e, -1e20) * scale

        m = jnp.max(e, axis=-1, keepdims=True)                  # (TB, Sq, 1)
        p = jnp.exp(e - m)
        denom = jnp.sum(p, axis=-1, keepdims=True)              # (TB, Sq, 1)

        # Deferred normalization: unnormalized attn @ v, scaled once at the end.
        o_un = jnp.einsum('bqk,bkd->bqd', p, vh,
                          preferred_element_type=jnp.float32)   # (TB, Sq, D)
        cat_ref[:, :, sl] = o_un * pl.reciprocal(denom, approx=True)

    # Concat-of-heads @ fc_out (+ bias), one lane-dense (E,E) matmul.
    cat = cat_ref[...].reshape(TB * Sq, E)
    out = jnp.dot(cat, wo_ref[...], preferred_element_type=jnp.float32) + bo_ref[...]
    o_ref[...] = out.reshape(TB, Sq, E)


def multi_head_attention(values, keys, query, mask,
                         w_values, w_keys, w_queries, w_fc, b_fc,
                         *, num_heads, batch_tile=8):
    """values/keys: (B, Sk, E), query: (B, Sq, E), mask: (B, Sq, Sk) (nonzero = attend).
    w_values/w_keys/w_queries: torch-style (D, D); w_fc: (E, E); b_fc: (E,). Returns (B, Sq, E)."""
    B, Sk, E = keys.shape
    Sq = query.shape[1]
    assert values.shape == (B, Sk, E) and query.shape == (B, Sq, E)
    assert E % num_heads == 0, "Embed size must be divisible by num_heads"
    D = E // num_heads
    scale = 1.0 / math.sqrt(E)   # canonical impl scales by sqrt(embed_size)

    # Lift the shared per-head Linear(D,D) to a block-diagonal (E,E) right-multiply;
    # pre-transpose fc_out weight; keep bias lane-dense as (1, E).
    eye_h = jnp.eye(num_heads, dtype=jnp.float32)
    wq_bd = jnp.kron(eye_h, w_queries.T.astype(jnp.float32))
    wk_bd = jnp.kron(eye_h, w_keys.T.astype(jnp.float32))
    wv_bd = jnp.kron(eye_h, w_values.T.astype(jnp.float32))
    wo_t = w_fc.T.astype(jnp.float32)
    bo = b_fc.reshape(1, E).astype(jnp.float32)
    mask_f = mask.astype(jnp.float32)

    TB = min(B, batch_tile)          # batch rows per grid step (whole batch for small B)
    grid = (pl.cdiv(B, TB),)

    kernel = partial(_mha_kernel, num_heads=num_heads, head_dim=D, scale=scale)

    return pl.pallas_call(
        kernel,
        out_shape=jax.ShapeDtypeStruct((B, Sq, E), jnp.float32),
        grid_spec=pltpu.PrefetchScalarGridSpec(
            num_scalar_prefetch=0,
            grid=grid,
            in_specs=[
                pl.BlockSpec((TB, Sq, E), lambda i: (i, 0, 0)),    # query
                pl.BlockSpec((TB, Sk, E), lambda i: (i, 0, 0)),    # keys
                pl.BlockSpec((TB, Sk, E), lambda i: (i, 0, 0)),    # values
                pl.BlockSpec((TB, Sq, Sk), lambda i: (i, 0, 0)),   # mask
                pl.BlockSpec((E, E), lambda i: (0, 0)),            # Wq (block-diag)
                pl.BlockSpec((E, E), lambda i: (0, 0)),            # Wk (block-diag)
                pl.BlockSpec((E, E), lambda i: (0, 0)),            # Wv (block-diag)
                pl.BlockSpec((E, E), lambda i: (0, 0)),            # fc_out weight^T
                pl.BlockSpec((1, E), lambda i: (0, 0)),            # fc_out bias
            ],
            out_specs=pl.BlockSpec((TB, Sq, E), lambda i: (i, 0, 0)),
            scratch_shapes=[pltpu.VMEM((TB, Sq, E), jnp.float32)],  # concat-of-heads buffer
        ),
        compiler_params=pltpu.CompilerParams(
            dimension_semantics=("parallel",),        # shards batch tiles across v7x's 2 TCs
            vmem_limit_bytes=32 * 1024 * 1024,        # safe on v5e/v6e/v7x; plenty for these tiles
        ),
    )(query, keys, values, mask_f, wq_bd, wk_bd, wv_bd, wo_t, bo)


def reference(values, keys, query, mask, w_values, w_keys, w_queries, w_fc, b_fc, num_heads):
    """Pure-JAX mirror of the canonical PyTorch forward implied by the module."""
    B, Sk, E = keys.shape
    Sq = query.shape[1]
    D = E // num_heads
    vh = values.reshape(B, Sk, num_heads, D) @ w_values.T
    kh = keys.reshape(B, Sk, num_heads, D) @ w_keys.T
    qh = query.reshape(B, Sq, num_heads, D) @ w_queries.T
    energy = jnp.einsum('bqhd,bkhd->bhqk', qh, kh)
    energy = jnp.where(mask[:, None, :, :] > 0, energy, -1e20)
    attn = jax.nn.softmax(energy / jnp.sqrt(float(E)), axis=-1)
    out = jnp.einsum('bhqk,bkhd->bqhd', attn, vh).reshape(B, Sq, E)
    return out @ w_fc.T + b_fc


if __name__ == "__main__":
    B, S, E, H = 2, 8, 32, 8
    D = E // H
    key = jax.random.PRNGKey(0)
    kq, kk, kv, k1, k2, k3, k4, k5 = jax.random.split(key, 8)

    query = jax.random.normal(kq, (B, S, E), dtype=jnp.float32)
    keys = jax.random.normal(kk, (B, S, E), dtype=jnp.float32)
    values = jax.random.normal(kv, (B, S, E), dtype=jnp.float32)

    # Causal mask (1 = attend, 0 = masked), shared across heads.
    mask = jnp.broadcast_to(jnp.tril(jnp.ones((S, S), jnp.float32)), (B, S, S))

    # torch nn.Linear-style uniform(-1/sqrt(fan_in), 1/sqrt(fan_in)) init.
    bd = 1.0 / math.sqrt(D)
    w_values = jax.random.uniform(k1, (D, D), jnp.float32, -bd, bd)
    w_keys = jax.random.uniform(k2, (D, D), jnp.float32, -bd, bd)
    w_queries = jax.random.uniform(k3, (D, D), jnp.float32, -bd, bd)
    be = 1.0 / math.sqrt(E)
    w_fc = jax.random.uniform(k4, (E, E), jnp.float32, -be, be)
    b_fc = jax.random.uniform(k5, (E,), jnp.float32, -be, be)

    out = multi_head_attention(values, keys, query, mask,
                               w_values, w_keys, w_queries, w_fc, b_fc,
                               num_heads=H)
    out = jax.block_until_ready(out)

    ref = reference(values, keys, query, mask,
                    w_values, w_keys, w_queries, w_fc, b_fc, H)
    assert out.shape == (B, S, E)
    # approx=True reciprocal in the softmax denominator -> slightly relaxed tolerance.
    assert jnp.allclose(out, ref, atol=2e-3, rtol=2e-3), float(jnp.max(jnp.abs(out - ref)))
    print("KERNEL_OK")
</pallas_src>

<mosaic_0001>
module attributes {stable_mosaic.version = 11 : i64} {
  func.func @_mha_kernel(%arg0: i32, %arg1: memref<2x8x32xf32, #tpu.memory_space<vmem>>, %arg2: memref<2x8x32xf32, #tpu.memory_space<vmem>>, %arg3: memref<2x8x32xf32, #tpu.memory_space<vmem>>, %arg4: memref<2x8x8xf32, #tpu.memory_space<vmem>>, %arg5: memref<32x32xf32, #tpu.memory_space<vmem>>, %arg6: memref<32x32xf32, #tpu.memory_space<vmem>>, %arg7: memref<32x32xf32, #tpu.memory_space<vmem>>, %arg8: memref<32x32xf32, #tpu.memory_space<vmem>>, %arg9: memref<1x32xf32, #tpu.memory_space<vmem>>, %arg10: memref<2x8x32xf32, #tpu.memory_space<vmem>>, %arg11: memref<2x8x32xf32, #tpu.memory_space<vmem>>) attributes {dimension_semantics = [#tpu.dimension_semantics<parallel>], iteration_bounds = array<i64: 1>, scalar_prefetch = 0 : i64, scratch_operands = 1 : i64, tpu.core_type = #tpu.core_type<tc>, window_params = [{transform_indices = @transform_0, window_bounds = array<i64: 2, 8, 32>}, {transform_indices = @transform_1, window_bounds = array<i64: 2, 8, 32>}, {transform_indices = @transform_2, window_bounds = array<i64: 2, 8, 32>}, {transform_indices = @transform_3, window_bounds = array<i64: 2, 8, 8>}, {pipeline_mode = #tpu.pipeline_mode<synchronous>, transform_indices = @transform_4, window_bounds = array<i64: 32, 32>}, {pipeline_mode = #tpu.pipeline_mode<synchronous>, transform_indices = @transform_5, window_bounds = array<i64: 32, 32>}, {pipeline_mode = #tpu.pipeline_mode<synchronous>, transform_indices = @transform_6, window_bounds = array<i64: 32, 32>}, {pipeline_mode = #tpu.pipeline_mode<synchronous>, transform_indices = @transform_7, window_bounds = array<i64: 32, 32>}, {pipeline_mode = #tpu.pipeline_mode<synchronous>, transform_indices = @transform_8, window_bounds = array<i64: 1, 32>}, {transform_indices = @transform_9, window_bounds = array<i64: 2, 8, 32>}]} {
    %c0 = arith.constant 0 : index
    %c0_0 = arith.constant 0 : index
    %c0_1 = arith.constant 0 : index
    %0 = vector.load %arg1[%c0, %c0_0, %c0_1] : memref<2x8x32xf32, #tpu.memory_space<vmem>>, vector<2x8x32xf32>
    %1 = vector.shape_cast %0 : vector<2x8x32xf32> to vector<16x32xf32>
    %c0_2 = arith.constant 0 : index
    %c0_3 = arith.constant 0 : index
    %c0_4 = arith.constant 0 : index
    %2 = vector.load %arg2[%c0_2, %c0_3, %c0_4] : memref<2x8x32xf32, #tpu.memory_space<vmem>>, vector<2x8x32xf32>
    %3 = vector.shape_cast %2 : vector<2x8x32xf32> to vector<16x32xf32>
    %c0_5 = arith.constant 0 : index
    %c0_6 = arith.constant 0 : index
    %c0_7 = arith.constant 0 : index
    %4 = vector.load %arg3[%c0_5, %c0_6, %c0_7] : memref<2x8x32xf32, #tpu.memory_space<vmem>>, vector<2x8x32xf32>
    %5 = vector.shape_cast %4 : vector<2x8x32xf32> to vector<16x32xf32>
    %c0_8 = arith.constant 0 : index
    %c0_9 = arith.constant 0 : index
    %6 = vector.load %arg5[%c0_8, %c0_9] : memref<32x32xf32, #tpu.memory_space<vmem>>, vector<32x32xf32>
    %cst = arith.constant dense<0.000000e+00> : vector<16x32xf32>
    %7 = tpu.matmul %1, %6, %cst {dimension_numbers = #tpu.dot_dimension_numbers<[1], [0], [0], [1], [0, 0, 1, 1], [], []>} : vector<16x32xf32>, vector<32x32xf32>, vector<16x32xf32> -> vector<16x32xf32>
    %8 = vector.shape_cast %7 : vector<16x32xf32> to vector<2x8x32xf32>
    %c0_10 = arith.constant 0 : index
    %c0_11 = arith.constant 0 : index
    %9 = vector.load %arg6[%c0_10, %c0_11] : memref<32x32xf32, #tpu.memory_space<vmem>>, vector<32x32xf32>
    %cst_12 = arith.constant dense<0.000000e+00> : vector<16x32xf32>
    %10 = tpu.matmul %3, %9, %cst_12 {dimension_numbers = #tpu.dot_dimension_numbers<[1], [0], [0], [1], [0, 0, 1, 1], [], []>} : vector<16x32xf32>, vector<32x32xf32>, vector<16x32xf32> -> vector<16x32xf32>
    %11 = vector.shape_cast %10 : vector<16x32xf32> to vector<2x8x32xf32>
    %c0_13 = arith.constant 0 : index
    %c0_14 = arith.constant 0 : index
    %12 = vector.load %arg7[%c0_13, %c0_14] : memref<32x32xf32, #tpu.memory_space<vmem>>, vector<32x32xf32>
    %cst_15 = arith.constant dense<0.000000e+00> : vector<16x32xf32>
    %13 = tpu.matmul %5, %12, %cst_15 {dimension_numbers = #tpu.dot_dimension_numbers<[1], [0], [0], [1], [0, 0, 1, 1], [], []>} : vector<16x32xf32>, vector<32x32xf32>, vector<16x32xf32> -> vector<16x32xf32>
    %14 = vector.shape_cast %13 : vector<16x32xf32> to vector<2x8x32xf32>
    %c0_16 = arith.constant 0 : index
    %c0_17 = arith.constant 0 : index
    %c0_18 = arith.constant 0 : index
    %15 = vector.load %arg4[%c0_16, %c0_17, %c0_18] : memref<2x8x8xf32, #tpu.memory_space<vmem>>, vector<2x8x8xf32>
    %cst_19 = arith.constant 0.000000e+00 : f32
    %16 = vector.broadcast %cst_19 : f32 to vector<2x8x8xf32>
    %17 = arith.cmpf ogt, %15, %16 : vector<2x8x8xf32>
    %18 = vector.extract_strided_slice %8 {offsets = [0, 0, 0], sizes = [2, 8, 4], strides = [1, 1, 1]} : vector<2x8x32xf32> to vector<2x8x4xf32>
    %19 = vector.extract_strided_slice %11 {offsets = [0, 0, 0], sizes = [2, 8, 4], strides = [1, 1, 1]} : vector<2x8x32xf32> to vector<2x8x4xf32>
    %20 = vector.extract_strided_slice %14 {offsets = [0, 0, 0], sizes = [2, 8, 4], strides = [1, 1, 1]} : vector<2x8x32xf32> to vector<2x8x4xf32>
    "tpu.trace_start"() <{level = 10 : i32, message = "bqd,bkd->bqk"}> : () -> ()
    %cst_20 = arith.constant dense<0.000000e+00> : vector<2x8x8xf32>
    %21 = tpu.matmul %18, %19, %cst_20 {dimension_numbers = #tpu.dot_dimension_numbers<[2], [2], [1], [1], [0, 0, 0, 1, 1, 1], [0], [0]>} : vector<2x8x4xf32>, vector<2x8x4xf32>, vector<2x8x8xf32> -> vector<2x8x8xf32>
    %cst_21 = arith.constant -1.000000e+20 : f32
    "tpu.trace_stop"() : () -> ()
    %22 = vector.broadcast %cst_21 : f32 to vector<2x8x8xf32>
    %23 = arith.select %17, %21, %22 : vector<2x8x8xi1>, vector<2x8x8xf32>
    %cst_22 = arith.constant 0.176776692 : f32
    %24 = vector.broadcast %cst_22 : f32 to vector<2x8x8xf32>
    %25 = arith.mulf %23, %24 : vector<2x8x8xf32>
    %cst_23 = arith.constant dense<0xFF800000> : vector<2x8xf32>
    %26 = vector.multi_reduction <maximumf>, %25, %cst_23 [2] : vector<2x8x8xf32> to vector<2x8xf32>
    %27 = vector.shape_cast %26 : vector<2x8xf32> to vector<2x8x1xf32>
    %28 = vector.broadcast %27 : vector<2x8x1xf32> to vector<2x8x8xf32>
    %29 = arith.subf %25, %28 : vector<2x8x8xf32>
    %30 = math.exp %29 : vector<2x8x8xf32>
    %cst_24 = arith.constant dense<0.000000e+00> : vector<2x8xf32>
    %31 = vector.multi_reduction <add>, %30, %cst_24 [2] : vector<2x8x8xf32> to vector<2x8xf32>
    %32 = vector.shape_cast %31 : vector<2x8xf32> to vector<2x8x1xf32>
    "tpu.trace_start"() <{level = 10 : i32, message = "bqk,bkd->bqd"}> : () -> ()
    %cst_25 = arith.constant dense<0.000000e+00> : vector<2x8x4xf32>
    %33 = tpu.matmul %30, %20, %cst_25 {dimension_numbers = #tpu.dot_dimension_numbers<[2], [1], [1], [2], [0, 0, 0, 1, 1, 2], [0], [0]>} : vector<2x8x8xf32>, vector<2x8x4xf32>, vector<2x8x4xf32> -> vector<2x8x4xf32>
    "tpu.trace_stop"() : () -> ()
    %34 = tpu.reciprocal %32 {approx = true} : vector<2x8x1xf32> -> vector<2x8x1xf32>
    %35 = vector.broadcast %34 : vector<2x8x1xf32> to vector<2x8x4xf32>
    %36 = arith.mulf %33, %35 : vector<2x8x4xf32>
    %c0_26 = arith.constant 0 : index
    %c0_27 = arith.constant 0 : index
    %c0_28 = arith.constant 0 : index
    %37 = vector.load %arg11[%c0_26, %c0_27, %c0_28] : memref<2x8x32xf32, #tpu.memory_space<vmem>>, vector<2x8x4xf32>
    tpu.vector_store %arg11[%c0_26, %c0_27, %c0_28], %36 {strides = array<i32>} : memref<2x8x32xf32, #tpu.memory_space<vmem>>, vector<2x8x4xf32>,
    %38 = vector.extract_strided_slice %8 {offsets = [0, 0, 4], sizes = [2, 8, 4], strides = [1, 1, 1]} : vector<2x8x32xf32> to vector<2x8x4xf32>
    %39 = vector.extract_strided_slice %11 {offsets = [0, 0, 4], sizes = [2, 8, 4], strides = [1, 1, 1]} : vector<2x8x32xf32> to vector<2x8x4xf32>
    %40 = vector.extract_strided_slice %14 {offsets = [0, 0, 4], sizes = [2, 8, 4], strides = [1, 1, 1]} : vector<2x8x32xf32> to vector<2x8x4xf32>
    "tpu.trace_start"() <{level = 10 : i32, message = "bqd,bkd->bqk"}> : () -> ()
    %cst_29 = arith.constant dense<0.000000e+00> : vector<2x8x8xf32>
    %41 = tpu.matmul %38, %39, %cst_29 {dimension_numbers = #tpu.dot_dimension_numbers<[2], [2], [1], [1], [0, 0, 0, 1, 1, 1], [0], [0]>} : vector<2x8x4xf32>, vector<2x8x4xf32>, vector<2x8x8xf32> -> vector<2x8x8xf32>
    %cst_30 = arith.constant -1.000000e+20 : f32
    "tpu.trace_stop"() : () -> ()
    %42 = vector.broadcast %cst_30 : f32 to vector<2x8x8xf32>
    %43 = arith.select %17, %41, %42 : vector<2x8x8xi1>, vector<2x8x8xf32>
    %cst_31 = arith.constant 0.176776692 : f32
    %44 = vector.broadcast %cst_31 : f32 to vector<2x8x8xf32>
    %45 = arith.mulf %43, %44 : vector<2x8x8xf32>
    %cst_32 = arith.constant dense<0xFF800000> : vector<2x8xf32>
    %46 = vector.multi_reduction <maximumf>, %45, %cst_32 [2] : vector<2x8x8xf32> to vector<2x8xf32>
    %47 = vector.shape_cast %46 : vector<2x8xf32> to vector<2x8x1xf32>
    %48 = vector.broadcast %47 : vector<2x8x1xf32> to vector<2x8x8xf32>
    %49 = arith.subf %45, %48 : vector<2x8x8xf32>
    %50 = math.exp %49 : vector<2x8x8xf32>
    %cst_33 = arith.constant dense<0.000000e+00> : vector<2x8xf32>
    %51 = vector.multi_reduction <add>, %50, %cst_33 [2] : vector<2x8x8xf32> to vector<2x8xf32>
    %52 = vector.shape_cast %51 : vector<2x8xf32> to vector<2x8x1xf32>
    "tpu.trace_start"() <{level = 10 : i32, message = "bqk,bkd->bqd"}> : () -> ()
    %cst_34 = arith.constant dense<0.000000e+00> : vector<2x8x4xf32>
    %53 = tpu.matmul %50, %40, %cst_34 {dimension_numbers = #tpu.dot_dimension_numbers<[2], [1], [1], [2], [0, 0, 0, 1, 1, 2], [0], [0]>} : vector<2x8x8xf32>, vector<2x8x4xf32>, vector<2x8x4xf32> -> vector<2x8x4xf32>
    "tpu.trace_stop"() : () -> ()
    %54 = tpu.reciprocal %52 {approx = true} : vector<2x8x1xf32> -> vector<2x8x1xf32>
    %55 = vector.broadcast %54 : vector<2x8x1xf32> to vector<2x8x4xf32>
    %56 = arith.mulf %53, %55 : vector<2x8x4xf32>
    %c0_35 = arith.constant 0 : index
    %c0_36 = arith.constant 0 : index
    %c4 = arith.constant 4 : index
    %57 = vector.load %arg11[%c0_35, %c0_36, %c4] : memref<2x8x32xf32, #tpu.memory_space<vmem>>, vector<2x8x4xf32>
    tpu.vector_store %arg11[%c0_35, %c0_36, %c4], %56 {strides = array<i32>} : memref<2x8x32xf32, #tpu.memory_space<vmem>>, vector<2x8x4xf32>,
    %58 = vector.extract_strided_slice %8 {offsets = [0, 0, 8], sizes = [2, 8, 4], strides = [1, 1, 1]} : vector<2x8x32xf32> to vector<2x8x4xf32>
    %59 = vector.extract_strided_slice %11 {offsets = [0, 0, 8], sizes = [2, 8, 4], strides = [1, 1, 1]} : vector<2x8x32xf32> to vector<2x8x4xf32>
    %60 = vector.extract_strided_slice %14 {offsets = [0, 0, 8], sizes = [2, 8, 4], strides = [1, 1, 1]} : vector<2x8x32xf32> to vector<2x8x4xf32>
    "tpu.trace_start"() <{level = 10 : i32, message = "bqd,bkd->bqk"}> : () -> ()
    %cst_37 = arith.constant dense<0.000000e+00> : vector<2x8x8xf32>
    %61 = tpu.matmul %58, %59, %cst_37 {dimension_numbers = #tpu.dot_dimension_numbers<[2], [2], [1], [1], [0, 0, 0, 1, 1, 1], [0], [0]>} : vector<2x8x4xf32>, vector<2x8x4xf32>, vector<2x8x8xf32> -> vector<2x8x8xf32>
    %cst_38 = arith.constant -1.000000e+20 : f32
    "tpu.trace_stop"() : () -> ()
    %62 = vector.broadcast %cst_38 : f32 to vector<2x8x8xf32>
    %63 = arith.select %17, %61, %62 : vector<2x8x8xi1>, vector<2x8x8xf32>
    %cst_39 = arith.constant 0.176776692 : f32
    %64 = vector.broadcast %cst_39 : f32 to vector<2x8x8xf32>
    %65 = arith.mulf %63, %64 : vector<2x8x8xf32>
    %cst_40 = arith.constant dense<0xFF800000> : vector<2x8xf32>
    %66 = vector.multi_reduction <maximumf>, %65, %cst_40 [2] : vector<2x8x8xf32> to vector<2x8xf32>
    %67 = vector.shape_cast %66 : vector<2x8xf32> to vector<2x8x1xf32>
    %68 = vector.broadcast %67 : vector<2x8x1xf32> to vector<2x8x8xf32>
    %69 = arith.subf %65, %68 : vector<2x8x8xf32>
    %70 = math.exp %69 : vector<2x8x8xf32>
    %cst_41 = arith.constant dense<0.000000e+00> : vector<2x8xf32>
    %71 = vector.multi_reduction <add>, %70, %cst_41 [2] : vector<2x8x8xf32> to vector<2x8xf32>
    %72 = vector.shape_cast %71 : vector<2x8xf32> to vector<2x8x1xf32>
    "tpu.trace_start"() <{level = 10 : i32, message = "bqk,bkd->bqd"}> : () -> ()
    %cst_42 = arith.constant dense<0.000000e+00> : vector<2x8x4xf32>
    %73 = tpu.matmul %70, %60, %cst_42 {dimension_numbers = #tpu.dot_dimension_numbers<[2], [1], [1], [2], [0, 0, 0, 1, 1, 2], [0], [0]>} : vector<2x8x8xf32>, vector<2x8x4xf32>, vector<2x8x4xf32> -> vector<2x8x4xf32>
    "tpu.trace_stop"() : () -> ()
    %74 = tpu.reciprocal %72 {approx = true} : vector<2x8x1xf32> -> vector<2x8x1xf32>
    %75 = vector.broadcast %74 : vector<2x8x1xf32> to vector<2x8x4xf32>
    %76 = arith.mulf %73, %75 : vector<2x8x4xf32>
    %c0_43 = arith.constant 0 : index
    %c0_44 = arith.constant 0 : index
    %c8 = arith.constant 8 : index
    %77 = vector.load %arg11[%c0_43, %c0_44, %c8] : memref<2x8x32xf32, #tpu.memory_space<vmem>>, vector<2x8x4xf32>
    tpu.vector_store %arg11[%c0_43, %c0_44, %c8], %76 {strides = array<i32>} : memref<2x8x32xf32, #tpu.memory_space<vmem>>, vector<2x8x4xf32>,
    %78 = vector.extract_strided_slice %8 {offsets = [0, 0, 12], sizes = [2, 8, 4], strides = [1, 1, 1]} : vector<2x8x32xf32> to vector<2x8x4xf32>
    %79 = vector.extract_strided_slice %11 {offsets = [0, 0, 12], sizes = [2, 8, 4], strides = [1, 1, 1]} : vector<2x8x32xf32> to vector<2x8x4xf32>
    %80 = vector.extract_strided_slice %14 {offsets = [0, 0, 12], sizes = [2, 8, 4], strides = [1, 1, 1]} : vector<2x8x32xf32> to vector<2x8x4xf32>
    "tpu.trace_start"() <{level = 10 : i32, message = "bqd,bkd->bqk"}> : () -> ()
    %cst_45 = arith.constant dense<0.000000e+00> : vector<2x8x8xf32>
    %81 = tpu.matmul %78, %79, %cst_45 {dimension_numbers = #tpu.dot_dimension_numbers<[2], [2], [1], [1], [0, 0, 0, 1, 1, 1], [0], [0]>} : vector<2x8x4xf32>, vector<2x8x4xf32>, vector<2x8x8xf32> -> vector<2x8x8xf32>
    %cst_46 = arith.constant -1.000000e+20 : f32
    "tpu.trace_stop"() : () -> ()
    %82 = vector.broadcast %cst_46 : f32 to vector<2x8x8xf32>
    %83 = arith.select %17, %81, %82 : vector<2x8x8xi1>, vector<2x8x8xf32>
    %cst_47 = arith.constant 0.176776692 : f32
    %84 = vector.broadcast %cst_47 : f32 to vector<2x8x8xf32>
    %85 = arith.mulf %83, %84 : vector<2x8x8xf32>
    %cst_48 = arith.constant dense<0xFF800000> : vector<2x8xf32>
    %86 = vector.multi_reduction <maximumf>, %85, %cst_48 [2] : vector<2x8x8xf32> to vector<2x8xf32>
    %87 = vector.shape_cast %86 : vector<2x8xf32> to vector<2x8x1xf32>
    %88 = vector.broadcast %87 : vector<2x8x1xf32> to vector<2x8x8xf32>
    %89 = arith.subf %85, %88 : vector<2x8x8xf32>
    %90 = math.exp %89 : vector<2x8x8xf32>
    %cst_49 = arith.constant dense<0.000000e+00> : vector<2x8xf32>
    %91 = vector.multi_reduction <add>, %90, %cst_49 [2] : vector<2x8x8xf32> to vector<2x8xf32>
    %92 = vector.shape_cast %91 : vector<2x8xf32> to vector<2x8x1xf32>
    "tpu.trace_start"() <{level = 10 : i32, message = "bqk,bkd->bqd"}> : () -> ()
    %cst_50 = arith.constant dense<0.000000e+00> : vector<2x8x4xf32>
    %93 = tpu.matmul %90, %80, %cst_50 {dimension_numbers = #tpu.dot_dimension_numbers<[2], [1], [1], [2], [0, 0, 0, 1, 1, 2], [0], [0]>} : vector<2x8x8xf32>, vector<2x8x4xf32>, vector<2x8x4xf32> -> vector<2x8x4xf32>
    "tpu.trace_stop"() : () -> ()
    %94 = tpu.reciprocal %92 {approx = true} : vector<2x8x1xf32> -> vector<2x8x1xf32>
    %95 = vector.broadcast %94 : vector<2x8x1xf32> to vector<2x8x4xf32>
    %96 = arith.mulf %93, %95 : vector<2x8x4xf32>
    %c0_51 = arith.constant 0 : index
    %c0_52 = arith.constant 0 : index
    %c12 = arith.constant 12 : index
    %97 = vector.load %arg11[%c0_51, %c0_52, %c12] : memref<2x8x32xf32, #tpu.memory_space<vmem>>, vector<2x8x4xf32>
    tpu.vector_store %arg11[%c0_51, %c0_52, %c12], %96 {strides = array<i32>} : memref<2x8x32xf32, #tpu.memory_space<vmem>>, vector<2x8x4xf32>,
    %98 = vector.extract_strided_slice %8 {offsets = [0, 0, 16], sizes = [2, 8, 4], strides = [1, 1, 1]} : vector<2x8x32xf32> to vector<2x8x4xf32>
    %99 = vector.extract_strided_slice %11 {offsets = [0, 0, 16], sizes = [2, 8, 4], strides = [1, 1, 1]} : vector<2x8x32xf32> to vector<2x8x4xf32>
    %100 = vector.extract_strided_slice %14 {offsets = [0, 0, 16], sizes = [2, 8, 4], strides = [1, 1, 1]} : vector<2x8x32xf32> to vector<2x8x4xf32>
    "tpu.trace_start"() <{level = 10 : i32, message = "bqd,bkd->bqk"}> : () -> ()
    %cst_53 = arith.constant dense<0.000000e+00> : vector<2x8x8xf32>
    %101 = tpu.matmul %98, %99, %cst_53 {dimension_numbers = #tpu.dot_dimension_numbers<[2], [2], [1], [1], [0, 0, 0, 1, 1, 1], [0], [0]>} : vector<2x8x4xf32>, vector<2x8x4xf32>, vector<2x8x8xf32> -> vector<2x8x8xf32>
    %cst_54 = arith.constant -1.000000e+20 : f32
    "tpu.trace_stop"() : () -> ()
    %102 = vector.broadcast %cst_54 : f32 to vector<2x8x8xf32>
    %103 = arith.select %17, %101, %102 : vector<2x8x8xi1>, vector<2x8x8xf32>
    %cst_55 = arith.constant 0.176776692 : f32
    %104 = vector.broadcast %cst_55 : f32 to vector<2x8x8xf32>
    %105 = arith.mulf %103, %104 : vector<2x8x8xf32>
    %cst_56 = arith.constant dense<0xFF800000> : vector<2x8xf32>
    %106 = vector.multi_reduction <maximumf>, %105, %cst_56 [2] : vector<2x8x8xf32> to vector<2x8xf32>
    %107 = vector.shape_cast %106 : vector<2x8xf32> to vector<2x8x1xf32>
    %108 = vector.broadcast %107 : vector<2x8x1xf32> to vector<2x8x8xf32>
    %109 = arith.subf %105, %108 : vector<2x8x8xf32>
    %110 = math.exp %109 : vector<2x8x8xf32>
    %cst_57 = arith.constant dense<0.000000e+00> : vector<2x8xf32>
    %111 = vector.multi_reduction <add>, %110, %cst_57 [2] : vector<2x8x8xf32> to vector<2x8xf32>
    %112 = vector.shape_cast %111 : vector<2x8xf32> to vector<2x8x1xf32>
    "tpu.trace_start"() <{level = 10 : i32, message = "bqk,bkd->bqd"}> : () -> ()
    %cst_58 = arith.constant dense<0.000000e+00> : vector<2x8x4xf32>
    %113 = tpu.matmul %110, %100, %cst_58 {dimension_numbers = #tpu.dot_dimension_numbers<[2], [1], [1], [2], [0, 0, 0, 1, 1, 2], [0], [0]>} : vector<2x8x8xf32>, vector<2x8x4xf32>, vector<2x8x4xf32> -> vector<2x8x4xf32>
    "tpu.trace_stop"() : () -> ()
    %114 = tpu.reciprocal %112 {approx = true} : vector<2x8x1xf32> -> vector<2x8x1xf32>
    %115 = vector.broadcast %114 : vector<2x8x1xf32> to vector<2x8x4xf32>
    %116 = arith.mulf %113, %115 : vector<2x8x4xf32>
    %c0_59 = arith.constant 0 : index
    %c0_60 = arith.constant 0 : index
    %c16 = arith.constant 16 : index
    %117 = vector.load %arg11[%c0_59, %c0_60, %c16] : memref<2x8x32xf32, #tpu.memory_space<vmem>>, vector<2x8x4xf32>
    tpu.vector_store %arg11[%c0_59, %c0_60, %c16], %116 {strides = array<i32>} : memref<2x8x32xf32, #tpu.memory_space<vmem>>, vector<2x8x4xf32>,
    %118 = vector.extract_strided_slice %8 {offsets = [0, 0, 20], sizes = [2, 8, 4], strides = [1, 1, 1]} : vector<2x8x32xf32> to vector<2x8x4xf32>
    %119 = vector.extract_strided_slice %11 {offsets = [0, 0, 20], sizes = [2, 8, 4], strides = [1, 1, 1]} : vector<2x8x32xf32> to vector<2x8x4xf32>
    %120 = vector.extract_strided_slice %14 {offsets = [0, 0, 20], sizes = [2, 8, 4], strides = [1, 1, 1]} : vector<2x8x32xf32> to vector<2x8x4xf32>
    "tpu.trace_start"() <{level = 10 : i32, message = "bqd,bkd->bqk"}> : () -> ()
    %cst_61 = arith.constant dense<0.000000e+00> : vector<2x8x8xf32>
    %121 = tpu.matmul %118, %119, %cst_61 {dimension_numbers = #tpu.dot_dimension_numbers<[2], [2], [1], [1], [0, 0, 0, 1, 1, 1], [0], [0]>} : vector<2x8x4xf32>, vector<2x8x4xf32>, vector<2x8x8xf32> -> vector<2x8x8xf32>
    %cst_62 = arith.constant -1.000000e+20 : f32
    "tpu.trace_stop"() : () -> ()
    %122 = vector.broadcast %cst_62 : f32 to vector<2x8x8xf32>
    %123 = arith.select %17, %121, %122 : vector<2x8x8xi1>, vector<2x8x8xf32>
    %cst_63 = arith.constant 0.176776692 : f32
    %124 = vector.broadcast %cst_63 : f32 to vector<2x8x8xf32>
    %125 = arith.mulf %123, %124 : vector<2x8x8xf32>
    %cst_64 = arith.constant dense<0xFF800000> : vector<2x8xf32>
    %126 = vector.multi_reduction <maximumf>, %125, %cst_64 [2] : vector<2x8x8xf32> to vector<2x8xf32>
    %127 = vector.shape_cast %126 : vector<2x8xf32> to vector<2x8x1xf32>
    %128 = vector.broadcast %127 : vector<2x8x1xf32> to vector<2x8x8xf32>
    %129 = arith.subf %125, %128 : vector<2x8x8xf32>
    %130 = math.exp %129 : vector<2x8x8xf32>
    %cst_65 = arith.constant dense<0.000000e+00> : vector<2x8xf32>
    %131 = vector.multi_reduction <add>, %130, %cst_65 [2] : vector<2x8x8xf32> to vector<2x8xf32>
    %132 = vector.shape_cast %131 : vector<2x8xf32> to vector<2x8x1xf32>
    "tpu.trace_start"() <{level = 10 : i32, message = "bqk,bkd->bqd"}> : () -> ()
    %cst_66 = arith.constant dense<0.000000e+00> : vector<2x8x4xf32>
    %133 = tpu.matmul %130, %120, %cst_66 {dimension_numbers = #tpu.dot_dimension_numbers<[2], [1], [1], [2], [0, 0, 0, 1, 1, 2], [0], [0]>} : vector<2x8x8xf32>, vector<2x8x4xf32>, vector<2x8x4xf32> -> vector<2x8x4xf32>
    "tpu.trace_stop"() : () -> ()
    %134 = tpu.reciprocal %132 {approx = true} : vector<2x8x1xf32> -> vector<2x8x1xf32>
    %135 = vector.broadcast %134 : vector<2x8x1xf32> to vector<2x8x4xf32>
    %136 = arith.mulf %133, %135 : vector<2x8x4xf32>
    %c0_67 = arith.constant 0 : index
    %c0_68 = arith.constant 0 : index
    %c20 = arith.constant 20 : index
    %137 = vector.load %arg11[%c0_67, %c0_68, %c20] : memref<2x8x32xf32, #tpu.memory_space<vmem>>, vector<2x8x4xf32>
    tpu.vector_store %arg11[%c0_67, %c0_68, %c20], %136 {strides = array<i32>} : memref<2x8x32xf32, #tpu.memory_space<vmem>>, vector<2x8x4xf32>,
    %138 = vector.extract_strided_slice %8 {offsets = [0, 0, 24], sizes = [2, 8, 4], strides = [1, 1, 1]} : vector<2x8x32xf32> to vector<2x8x4xf32>
    %139 = vector.extract_strided_slice %11 {offsets = [0, 0, 24], sizes = [2, 8, 4], strides = [1, 1, 1]} : vector<2x8x32xf32> to vector<2x8x4xf32>
    %140 = vector.extract_strided_slice %14 {offsets = [0, 0, 24], sizes = [2, 8, 4], strides = [1, 1, 1]} : vector<2x8x32xf32> to vector<2x8x4xf32>
    "tpu.trace_start"() <{level = 10 : i32, message = "bqd,bkd->bqk"}> : () -> ()
    %cst_69 = arith.constant dense<0.000000e+00> : vector<2x8x8xf32>
    %141 = tpu.matmul %138, %139, %cst_69 {dimension_numbers = #tpu.dot_dimension_numbers<[2], [2], [1], [1], [0, 0, 0, 1, 1, 1], [0], [0]>} : vector<2x8x4xf32>, vector<2x8x4xf32>, vector<2x8x8xf32> -> vector<2x8x8xf32>
    %cst_70 = arith.constant -1.000000e+20 : f32
    "tpu.trace_stop"() : () -> ()
    %142 = vector.broadcast %cst_70 : f32 to vector<2x8x8xf32>
    %143 = arith.select %17, %141, %142 : vector<2x8x8xi1>, vector<2x8x8xf32>
    %cst_71 = arith.constant 0.176776692 : f32
    %144 = vector.broadcast %cst_71 : f32 to vector<2x8x8xf32>
    %145 = arith.mulf %143, %144 : vector<2x8x8xf32>
    %cst_72 = arith.constant dense<0xFF800000> : vector<2x8xf32>
    %146 = vector.multi_reduction <maximumf>, %145, %cst_72 [2] : vector<2x8x8xf32> to vector<2x8xf32>
    %147 = vector.shape_cast %146 : vector<2x8xf32> to vector<2x8x1xf32>
    %148 = vector.broadcast %147 : vector<2x8x1xf32> to vector<2x8x8xf32>
    %149 = arith.subf %145, %148 : vector<2x8x8xf32>
    %150 = math.exp %149 : vector<2x8x8xf32>
    %cst_73 = arith.constant dense<0.000000e+00> : vector<2x8xf32>
    %151 = vector.multi_reduction <add>, %150, %cst_73 [2] : vector<2x8x8xf32> to vector<2x8xf32>
    %152 = vector.shape_cast %151 : vector<2x8xf32> to vector<2x8x1xf32>
    "tpu.trace_start"() <{level = 10 : i32, message = "bqk,bkd->bqd"}> : () -> ()
    %cst_74 = arith.constant dense<0.000000e+00> : vector<2x8x4xf32>
    %153 = tpu.matmul %150, %140, %cst_74 {dimension_numbers = #tpu.dot_dimension_numbers<[2], [1], [1], [2], [0, 0, 0, 1, 1, 2], [0], [0]>} : vector<2x8x8xf32>, vector<2x8x4xf32>, vector<2x8x4xf32> -> vector<2x8x4xf32>
    "tpu.trace_stop"() : () -> ()
    %154 = tpu.reciprocal %152 {approx = true} : vector<2x8x1xf32> -> vector<2x8x1xf32>
    %155 = vector.broadcast %154 : vector<2x8x1xf32> to vector<2x8x4xf32>
    %156 = arith.mulf %153, %155 : vector<2x8x4xf32>
    %c0_75 = arith.constant 0 : index
    %c0_76 = arith.constant 0 : index
    %c24 = arith.constant 24 : index
    %157 = vector.load %arg11[%c0_75, %c0_76, %c24] : memref<2x8x32xf32, #tpu.memory_space<vmem>>, vector<2x8x4xf32>
    tpu.vector_store %arg11[%c0_75, %c0_76, %c24], %156 {strides = array<i32>} : memref<2x8x32xf32, #tpu.memory_space<vmem>>, vector<2x8x4xf32>,
    %158 = vector.extract_strided_slice %8 {offsets = [0, 0, 28], sizes = [2, 8, 4], strides = [1, 1, 1]} : vector<2x8x32xf32> to vector<2x8x4xf32>
    %159 = vector.extract_strided_slice %11 {offsets = [0, 0, 28], sizes = [2, 8, 4], strides = [1, 1, 1]} : vector<2x8x32xf32> to vector<2x8x4xf32>
    %160 = vector.extract_strided_slice %14 {offsets = [0, 0, 28], sizes = [2, 8, 4], strides = [1, 1, 1]} : vector<2x8x32xf32> to vector<2x8x4xf32>
    "tpu.trace_start"() <{level = 10 : i32, message = "bqd,bkd->bqk"}> : () -> ()
    %cst_77 = arith.constant dense<0.000000e+00> : vector<2x8x8xf32>
    %161 = tpu.matmul %158, %159, %cst_77 {dimension_numbers = #tpu.dot_dimension_numbers<[2], [2], [1], [1], [0, 0, 0, 1, 1, 1], [0], [0]>} : vector<2x8x4xf32>, vector<2x8x4xf32>, vector<2x8x8xf32> -> vector<2x8x8xf32>
    %cst_78 = arith.constant -1.000000e+20 : f32
    "tpu.trace_stop"() : () -> ()
    %162 = vector.broadcast %cst_78 : f32 to vector<2x8x8xf32>
    %163 = arith.select %17, %161, %162 : vector<2x8x8xi1>, vector<2x8x8xf32>
    %cst_79 = arith.constant 0.176776692 : f32
    %164 = vector.broadcast %cst_79 : f32 to vector<2x8x8xf32>
    %165 = arith.mulf %163, %164 : vector<2x8x8xf32>
    %cst_80 = arith.constant dense<0xFF800000> : vector<2x8xf32>
    %166 = vector.multi_reduction <maximumf>, %165, %cst_80 [2] : vector<2x8x8xf32> to vector<2x8xf32>
    %167 = vector.shape_cast %166 : vector<2x8xf32> to vector<2x8x1xf32>
    %168 = vector.broadcast %167 : vector<2x8x1xf32> to vector<2x8x8xf32>
    %169 = arith.subf %165, %168 : vector<2x8x8xf32>
    %170 = math.exp %169 : vector<2x8x8xf32>
    %cst_81 = arith.constant dense<0.000000e+00> : vector<2x8xf32>
    %171 = vector.multi_reduction <add>, %170, %cst_81 [2] : vector<2x8x8xf32> to vector<2x8xf32>
    %172 = vector.shape_cast %171 : vector<2x8xf32> to vector<2x8x1xf32>
    "tpu.trace_start"() <{level = 10 : i32, message = "bqk,bkd->bqd"}> : () -> ()
    %cst_82 = arith.constant dense<0.000000e+00> : vector<2x8x4xf32>
    %173 = tpu.matmul %170, %160, %cst_82 {dimension_numbers = #tpu.dot_dimension_numbers<[2], [1], [1], [2], [0, 0, 0, 1, 1, 2], [0], [0]>} : vector<2x8x8xf32>, vector<2x8x4xf32>, vector<2x8x4xf32> -> vector<2x8x4xf32>
    "tpu.trace_stop"() : () -> ()
    %174 = tpu.reciprocal %172 {approx = true} : vector<2x8x1xf32> -> vector<2x8x1xf32>
    %175 = vector.broadcast %174 : vector<2x8x1xf32> to vector<2x8x4xf32>
    %176 = arith.mulf %173, %175 : vector<2x8x4xf32>
    %c0_83 = arith.constant 0 : index
    %c0_84 = arith.constant 0 : index
    %c28 = arith.constant 28 : index
    %177 = vector.load %arg11[%c0_83, %c0_84, %c28] : memref<2x8x32xf32, #tpu.memory_space<vmem>>, vector<2x8x4xf32>
    tpu.vector_store %arg11[%c0_83, %c0_84, %c28], %176 {strides = array<i32>} : memref<2x8x32xf32, #tpu.memory_space<vmem>>, vector<2x8x4xf32>,
    %c0_85 = arith.constant 0 : index
    %c0_86 = arith.constant 0 : index
    %c0_87 = arith.constant 0 : index
    %178 = vector.load %arg11[%c0_85, %c0_86, %c0_87] : memref<2x8x32xf32, #tpu.memory_space<vmem>>, vector<2x8x32xf32>
    %179 = vector.shape_cast %178 : vector<2x8x32xf32> to vector<16x32xf32>
    %c0_88 = arith.constant 0 : index
    %c0_89 = arith.constant 0 : index
    %180 = vector.load %arg8[%c0_88, %c0_89] : memref<32x32xf32, #tpu.memory_space<vmem>>, vector<32x32xf32>
    %cst_90 = arith.constant dense<0.000000e+00> : vector<16x32xf32>
    %181 = tpu.matmul %179, %180, %cst_90 {dimension_numbers = #tpu.dot_dimension_numbers<[1], [0], [0], [1], [0, 0, 1, 1], [], []>} : vector<16x32xf32>, vector<32x32xf32>, vector<16x32xf32> -> vector<16x32xf32>
    %c0_91 = arith.constant 0 : index
    %c0_92 = arith.constant 0 : index
    %182 = vector.load %arg9[%c0_91, %c0_92] : memref<1x32xf32, #tpu.memory_space<vmem>>, vector<1x32xf32>
    %183 = vector.broadcast %182 : vector<1x32xf32> to vector<16x32xf32>
    %184 = arith.addf %181, %183 : vector<16x32xf32>
    %185 = vector.shape_cast %184 : vector<16x32xf32> to vector<2x8x32xf32>
    %c0_93 = arith.constant 0 : index
    %c0_94 = arith.constant 0 : index
    %c0_95 = arith.constant 0 : index
    %186 = vector.load %arg10[%c0_93, %c0_94, %c0_95] : memref<2x8x32xf32, #tpu.memory_space<vmem>>, vector<2x8x32xf32>
    tpu.vector_store %arg10[%c0_93, %c0_94, %c0_95], %185 {strides = array<i32>} : memref<2x8x32xf32, #tpu.memory_space<vmem>>, vector<2x8x32xf32>,
    return
  }
  func.func @transform_0(%arg0: i32) -> (i32, i32, i32) {
    %c0_i32 = arith.constant 0 : i32
    %c0_i32_0 = arith.constant 0 : i32
    %c0_i32_1 = arith.constant 0 : i32
    return %arg0, %c0_i32, %c0_i32_0 : i32, i32, i32
  }
  func.func @transform_1(%arg0: i32) -> (i32, i32, i32) {
    %c0_i32 = arith.constant 0 : i32
    %c0_i32_0 = arith.constant 0 : i32
    %c0_i32_1 = arith.constant 0 : i32
    return %arg0, %c0_i32, %c0_i32_0 : i32, i32, i32
  }
  func.func @transform_2(%arg0: i32) -> (i32, i32, i32) {
    %c0_i32 = arith.constant 0 : i32
    %c0_i32_0 = arith.constant 0 : i32
    %c0_i32_1 = arith.constant 0 : i32
    return %arg0, %c0_i32, %c0_i32_0 : i32, i32, i32
  }
  func.func @transform_3(%arg0: i32) -> (i32, i32, i32) {
    %c0_i32 = arith.constant 0 : i32
    %c0_i32_0 = arith.constant 0 : i32
    %c0_i32_1 = arith.constant 0 : i32
    return %arg0, %c0_i32, %c0_i32_0 : i32, i32, i32
  }
  func.func @transform_4(%arg0: i32) -> (i32, i32) {
    %c0_i32 = arith.constant 0 : i32
    %c0_i32_0 = arith.constant 0 : i32
    %c0_i32_1 = arith.constant 0 : i32
    return %c0_i32, %c0_i32_0 : i32, i32
  }
  func.func @transform_5(%arg0: i32) -> (i32, i32) {
    %c0_i32 = arith.constant 0 : i32
    %c0_i32_0 = arith.constant 0 : i32
    %c0_i32_1 = arith.constant 0 : i32
    return %c0_i32, %c0_i32_0 : i32, i32
  }
  func.func @transform_6(%arg0: i32) -> (i32, i32) {
    %c0_i32 = arith.constant 0 : i32
    %c0_i32_0 = arith.constant 0 : i32
    %c0_i32_1 = arith.constant 0 : i32
    return %c0_i32, %c0_i32_0 : i32, i32
  }
  func.func @transform_7(%arg0: i32) -> (i32, i32) {
    %c0_i32 = arith.constant 0 : i32
    %c0_i32_0 = arith.constant 0 : i32
    %c0_i32_1 = arith.constant 0 : i32
    return %c0_i32, %c0_i32_0 : i32, i32
  }
  func.func @transform_8(%arg0: i32) -> (i32, i32) {
    %c0_i32 = arith.constant 0 : i32
    %c0_i32_0 = arith.constant 0 : i32
    %c0_i32_1 = arith.constant 0 : i32
    return %c0_i32, %c0_i32_0 : i32, i32
  }
  func.func @transform_9(%arg0: i32) -> (i32, i32, i32) {
    %c0_i32 = arith.constant 0 : i32
    %c0_i32_0 = arith.constant 0 : i32
    %c0_i32_1 = arith.constant 0 : i32
    return %arg0, %c0_i32, %c0_i32_0 : i32, i32, i32
  }
}

</mosaic_0001>

<bundles_post_ra>
// kernel: tpu_custom_call.1
= control target key start
LH: loop header
LB: loop body
LE: loop exit
PB: predicated region body
PF: predicated region fallthrough
CT: control target
= control target key end

     0   :  { %14 = vsyncpa [#allocation4], 0  ;;  %s4456_s0 = inlined_call_operand.hbm [shape: f32[2,8,32], index: 0, kind: input, shape index: {}]   ;;  %s4457_s1 = inlined_call_operand.hbm [shape: f32[2,8,32], index: 1, kind: input, shape index: {}]   ;;  %s4458_s2 = inlined_call_operand.hbm [shape: f32[2,8,32], index: 2, kind: input, shape index: {}]   ;;  %s4459_s3 = inlined_call_operand.hbm [shape: f32[2,8,8], index: 3, kind: input, shape index: {}]   ;;  %s4460_s4 = inlined_call_operand.hbm [shape: f32[32,32], index: 4, kind: input, shape index: {}]   ;;  %s4461_s5 = inlined_call_operand.hbm [shape: f32[32,32], index: 5, kind: input, shape index: {}]   ;;  %s4462_s6 = inlined_call_operand.hbm [shape: f32[32,32], index: 6, kind: input, shape index: {}]   ;;  %s4463_s7 = inlined_call_operand.hbm [shape: f32[32,32], index: 7, kind: input, shape index: {}]   ;;  %s4464_s8 = inlined_call_operand.vmem [shape: f32[1,32], index: 8, kind: input, shape index: {}]   ;;  %s4465_s9 = inlined_call_operand.hbm [shape: f32[2,8,32], index: 9, kind: output, shape index: {}]  }
   0x1   :  { %15 = vsyncpa [#allocation7], 0 }
   0x2   :  { %16 = vsyncpa [#allocation10], 0 }
   0x3   :  { %17 = vsyncpa [#allocation13], 0 }
   0x4   :  { %18 = vsyncpa [#allocation16], 0 }
   0x5   :  { %19 = vsyncpa [#allocation5], 0  ;;  %s3901_s30 = smov [#allocation6]   ;;  %s3902_s11 = smov [#allocation9]  }
   0x6   :  { %s37_s10 = sshll.u32 %s3901_s30, 4  ;;  %s61_s12 = sshll.u32 %s3902_s11, 4  ;;  %s38_s10 = int_to_ptr.vmem [resolvable:$true] %s37_s10  ;;  %s62_s12 = int_to_ptr.vmem [resolvable:$true] %s61_s12 }
   0x7   :  { %s3717_s13 = scalar_lea.vmem %s38_s10, 256  ;;  %p3722_p1 = scmp.lt.s32.totalorder %s38_s10, %s38_s10 }
   0x8   :  { %p3718_p0 = scmp.ne.s32.totalorder %s38_s10, %s3717_s13  ;;  %p3723_p2 = scmp.lt.s32.totalorder %s3717_s13, %s3717_s13 }
   0xa   :  { %p3724_p3 = por %p3723_p2, %p3722_p1 }
   0xc   :  { %p3725_p4 = pnand %p3724_p3, %p3718_p0 }
   0xe   :  { %3728 = shalt.err (!%p3725_p4)
}
   0xf   :  { %s3903_s14 = smov 128   ;;  %s3904_s15 = smov 8  }
  0x10   :  { %43 = dma.hbm_to_vmem [thread:$0]  %s4457_s1, 256, %s38_s10, [#allocation7], %s3903_s14, %s3903_s14, %s3904_s15  }
  0x11   :  { %s3737_s18 = scalar_lea.vmem %s62_s12, 256  ;;  %p3742_p6 = scmp.lt.s32.totalorder %s62_s12, %s62_s12 }
  0x12   :  { %p3738_p5 = scmp.ne.s32.totalorder %s62_s12, %s3737_s18  ;;  %p3743_p7 = scmp.lt.s32.totalorder %s3737_s18, %s3737_s18 }
  0x14   :  { %p3744_p8 = por %p3743_p7, %p3742_p6 }
  0x16   :  { %p3745_p9 = pnand %p3744_p8, %p3738_p5 }
  0x18   :  { %3748 = shalt.err (!%p3745_p9)
}
  0x19   :  { %67 = dma.hbm_to_vmem [thread:$0]  %s4459_s3, 256, %s62_s12, [#allocation10], %s3903_s14, %s3903_s14, %s3904_s15  }
  0x1a   :  { %s3905_s21 = smov [#allocation12]   ;;  %s3906_s23 = smov [#allocation3]  }
  0x1b   :  { %s85_s22 = sshll.u32 %s3905_s21, 4  ;;  %s25_s24 = sshll.u32 %s3906_s23, 4  ;;  %s86_s22 = int_to_ptr.vmem [resolvable:$true] %s85_s22  ;;  %s26_s24 = int_to_ptr.vmem [resolvable:$true] %s25_s24 }
  0x1c   :  { %s3757_s1 = scalar_lea.vmem %s86_s22, 512  ;;  %p3762_p11 = scmp.lt.s32.totalorder %s86_s22, %s86_s22 }
  0x1d   :  { %p3758_p10 = scmp.ne.s32.totalorder %s86_s22, %s3757_s1  ;;  %p3763_p12 = scmp.lt.s32.totalorder %s3757_s1, %s3757_s1 }
  0x1f   :  { %p3764_p13 = por %p3763_p12, %p3762_p11 }
  0x21   :  { %p3765_p0 = pnand %p3764_p13, %p3758_p10 }
  0x23   :  { %3768 = shalt.err (!%p3765_p0)
}
  0x24   :  { %91 = dma.hbm_to_vmem [thread:$0]  %s4461_s5, 512, %s86_s22, [#allocation13], %s3903_s14, %s3903_s14, %s3904_s15  }
  0x25   :  { %s3777_s3 = scalar_lea.vmem %s26_s24, 256  ;;  %p3782_p2 = scmp.lt.s32.totalorder %s26_s24, %s26_s24 }
  0x26   :  { %p3778_p1 = scmp.ne.s32.totalorder %s26_s24, %s3777_s3  ;;  %p3783_p3 = scmp.lt.s32.totalorder %s3777_s3, %s3777_s3 }
  0x28   :  { %p3784_p4 = por %p3783_p3, %p3782_p2 }
  0x2a   :  { %p3785_p5 = pnand %p3784_p4, %p3778_p1 }
  0x2c   :  { %3788 = shalt.err (!%p3785_p5)
}
  0x2d   :  { %31 = dma.hbm_to_vmem [thread:$0]  %s4456_s0, 256, %s26_s24, [#allocation4], %s3903_s14, %s3903_s14, %s3904_s15  }
  0x2e   :  { %s3907_s29 = smov [#allocation8]   ;;  %s3908_s10 = smov [#allocation11]  }
  0x2f   :  { %s49_s30 = sshll.u32 %s3907_s29, 4  ;;  %s73_s11 = sshll.u32 %s3908_s10, 4  ;;  %s50_s30 = int_to_ptr.vmem [resolvable:$true] %s49_s30  ;;  %s74_s11 = int_to_ptr.vmem [resolvable:$true] %s73_s11 }
  0x30   :  { %s3797_s5 = scalar_lea.vmem %s50_s30, 256  ;;  %p3802_p7 = scmp.lt.s32.totalorder %s50_s30, %s50_s30 }
  0x31   :  { %p3798_p6 = scmp.ne.s32.totalorder %s50_s30, %s3797_s5  ;;  %p3803_p8 = scmp.lt.s32.totalorder %s3797_s5, %s3797_s5 }
  0x33   :  { %p3804_p9 = por %p3803_p8, %p3802_p7 }
  0x35   :  { %p3805_p10 = pnand %p3804_p9, %p3798_p6 }
  0x37   :  { %3808 = shalt.err (!%p3805_p10)
}
  0x38   :  { %55 = dma.hbm_to_vmem [thread:$0]  %s4458_s2, 256, %s50_s30, [#allocation7], %s3903_s14, %s3903_s14, %s3904_s15  }
  0x39   :  { %s3817_s0 = scalar_lea.vmem %s74_s11, 512  ;;  %p3822_p12 = scmp.lt.s32.totalorder %s74_s11, %s74_s11 }
  0x3a   :  { %p3818_p11 = scmp.ne.s32.totalorder %s74_s11, %s3817_s0  ;;  %p3823_p13 = scmp.lt.s32.totalorder %s3817_s0, %s3817_s0 }
  0x3c   :  { %p3824_p0 = por %p3823_p13, %p3822_p12 }
  0x3e   :  { %p3825_p1 = pnand %p3824_p0, %p3818_p11 }
  0x40   :  { %3828 = shalt.err (!%p3825_p1)
}
  0x41   :  { %79 = dma.hbm_to_vmem [thread:$0]  %s4460_s4, 512, %s74_s11, [#allocation10], %s3903_s14, %s3903_s14, %s3904_s15  }
  0x42   :  { %s3909_s18 = smov [#allocation14]   ;;  %s3910_s20 = smov [#allocation15]  }
  0x43   :  { %s97_s19 = sshll.u32 %s3909_s18, 4  ;;  %s109_s21 = sshll.u32 %s3910_s20, 4  ;;  %s98_s19 = int_to_ptr.vmem [resolvable:$true] %s97_s19  ;;  %s110_s21 = int_to_ptr.vmem [resolvable:$true] %s109_s21 }
  0x44   :  { %s3837_s2 = scalar_lea.vmem %s98_s19, 512  ;;  %p3842_p3 = scmp.lt.s32.totalorder %s98_s19, %s98_s19 }
  0x45   :  { %p3838_p2 = scmp.ne.s32.totalorder %s98_s19, %s3837_s2  ;;  %p3843_p4 = scmp.lt.s32.totalorder %s3837_s2, %s3837_s2 }
  0x47   :  { %p3844_p5 = por %p3843_p4, %p3842_p3 }
  0x49   :  { %p3845_p6 = pnand %p3844_p5, %p3838_p2 }
  0x4b   :  { %3848 = shalt.err (!%p3845_p6)
}
  0x4c   :  { %103 = dma.hbm_to_vmem [thread:$0]  %s4462_s6, 512, %s98_s19, [#allocation13], %s3903_s14, %s3903_s14, %s3904_s15  }
  0x4d   :  { %s3857_s4 = scalar_lea.vmem %s110_s21, 512  ;;  %p3862_p8 = scmp.lt.s32.totalorder %s110_s21, %s110_s21 }
  0x4e   :  { %p3858_p7 = scmp.ne.s32.totalorder %s110_s21, %s3857_s4  ;;  %p3863_p9 = scmp.lt.s32.totalorder %s3857_s4, %s3857_s4 }
  0x50   :  { %p3864_p10 = por %p3863_p9, %p3862_p8 }
  0x52   :  { %p3865_p11 = pnand %p3864_p10, %p3858_p7 }
  0x54   :  { %3868 = shalt.err (!%p3865_p11)
}
  0x55   :  { %115 = dma.hbm_to_vmem [thread:$0]  %s4463_s7, 512, %s110_s21, [#allocation16], %s3903_s14, %s3903_s14, %s3904_s15  }
  0x56   :  { %3889 = dma.done.wait [#allocation4], 256  }
  0x57   :  { %3890 = vsyncadd [#allocation4], 4294967040 }
  0x58   :  { %3891 = dma.done.wait [#allocation7], 512  }
  0x59   :  { %3892 = vsyncadd [#allocation7], 4294966784 }
  0x5a   :  { %3893 = dma.done.wait [#allocation10], 768  }
  0x5b   :  { %3894 = vsyncadd [#allocation10], 4294966528 }
  0x5c   :  { %3895 = dma.done.wait [#allocation13], 1024  }
  0x5d   :  { %3896 = vsyncadd [#allocation13], 4294966272 }
  0x5e   :  { %3897 = dma.done.wait [#allocation16], 512  }
  0x5f   :  { %3898 = vsyncadd [#allocation16], 4294966784  ;;  %v237_v0 = vld [vmem:[#allocation12 + $0x18] sm:$0xff]  ;;  %v236_v2 = vld [vmem:[#allocation12 + $0x10] sm:$0xff]  ;;  %vm152_vm0 = vcmask 261120   ;;  %v3911_v12 = vmov 0.0  }
  0x60   :  { %v151_v1 = vld [vmem:[#allocation11 + $0x18] sm:$0xff]  ;;  %3426 = vmatprep.subr.mxu1 %v237_v0  ;;  %v150_v3 = vld [vmem:[#allocation11 + $0x10] sm:$0xff]  ;;  %v235_v4 = vld [vmem:[#allocation12 + $0x8] sm:$0xff]  ;;  %vm3912_vm1 = vmmov 0   ;;  %vm408_vm2 = vcmask 31744   ;;  %s3913_s6 = smov 124  }
  0x61   :  { %3415 = vmatprep.subr.mxu0 %v151_v1  ;;  %3427 = vmatpush3.msra.mxu1 %v237_v0  ;;  %v149_v5 = vld [vmem:[#allocation11 + $0x8] sm:$0xff]  ;;  %v234_v6 = vld [vmem:[#allocation12] sm:$0xff]  ;;  %v144_v7 = vld [vmem:[#allocation6] sm:$0xff]  ;;  %vm565_vm4 = vcmask 64512   ;;  %s3914_s7 = smov 120   ;;  %s3915_s25 = smov 116  }
  0x62   :  { %3416 = vmatpush3.msra.mxu0 %v151_v1  ;;  %3428 = vmatprep.subr.mxu1 %v236_v2  ;;  %v148_v8 = vld [vmem:[#allocation11] sm:$0xff]  ;;  %v145_v9 = vld [vmem:[#allocation6 + $0x8] sm:$0xff]  ;;  %v143_v11 = vld [vmem:[#allocation3 + $0x8] sm:$0xff]  ;;  %s3916_s26 = smov 112   ;;  %s3917_s3 = smov 108   ;;  %vm1080_vm6 = vcmask 64544  }
  0x63   :  { %3417 = vmatprep.subr.mxu0 %v150_v3  ;;  %3429 = vmatpush3.msra.mxu1 %v236_v2  ;;  %v142_v10 = vld [vmem:[#allocation3] sm:$0xff]  ;;  %v322_v13 = vld [vmem:[#allocation14 + $0x18] sm:$0xff]  ;;  %v321_v14 = vld [vmem:[#allocation14 + $0x10] sm:$0xff]  ;;  %s3918_s27 = smov 104   ;;  %s3919_s28 = smov 100   ;;  %vm1425_vm7 = vcmask 97344  }
  0x64   :  { %3418 = vmatpush3.msra.mxu0 %v150_v3  ;;  %3430 = vmatprep.subr.mxu1 %v235_v4  ;;  %v320_v15 = vld [vmem:[#allocation14 + $0x8] sm:$0xff]  ;;  %v319_v16 = vld [vmem:[#allocation14] sm:$0xff]  ;;  %v4067_v24 = vld [vmem:[#allocation9] sm:$0xff]  ;;  %s3920_s29 = smov 4   ;;  %s3921_s30 = smov 12   ;;  %vm1770_vm8 = vcmask 130144  }
  0x65   :  { %3419 = vmatprep.subr.mxu0 %v149_v5  ;;  %3431 = vmatpush3.msra.mxu1 %v235_v4  ;;  %v146_v17 = vld [vmem:[#allocation8] sm:$0xff]  ;;  %v147_v18 = vld [vmem:[#allocation8 + $0x8] sm:$0xff]  ;;  %vm406_vm3 = vcmp.gt.f32.partialorder %v4067_v24, 0.0  ;;  %v4070_v25 = vld [vmem:[#allocation9 + $0x8] sm:$0xff]  ;;  %s3922_s10 = smov 16   ;;  %s3923_s11 = smov 20  }
  0x66   :  { %3420 = vmatpush3.msra.mxu0 %v149_v5  ;;  %3432 = vmatprep.subr.mxu1 %v234_v6  ;;  %vm407_vm5 = vcmp.gt.f32.partialorder %v4070_v25, 0.0  ;;  %s3924_s5 = smov 24   ;;  %vm2115_vm9 = vcmask 162944   ;;  %vm2460_vm10 = vcmask 195744   ;;  %vm2805_vm11 = vcmask 228544   ;;  %s3925_s12 = smov 28  }
  0x67   :  { %3434 = vmatprep.mubr.msk.f32.mxu1 %vm152_vm0, %v144_v7  ;;  %3433 = vmatpush3.msra.mxu1 %v234_v6  ;;  %vm3150_vm12 = vcmask 261344   ;;  %s3926_s16 = smov [#allocation17]  }
  0x68   :  { %3421 = vmatprep.subr.mxu0 %v148_v8  ;;  %3435 = vmatmul.mubr.msk.f32.vlgmr.msra.gmra.mxu1 %vm152_vm0, %v145_v9  ;;  %s3254_s17 = sshll.u32 %s3926_s16, 4  ;;  %s3255_s17 = int_to_ptr.vmem [resolvable:$true] %s3254_s17 }
  0x69   :  { %3422 = vmatpush3.msra.mxu0 %v148_v8  ;;  %3423 = vmatprep.mubr.msk.f32.mxu0 %vm152_vm0, %v142_v10  ;;  %s3869_s18 = scalar_lea.vmem %s3255_s17, 256  ;;  %p3874_p13 = scmp.lt.s32.totalorder %s3255_s17, %s3255_s17 }
  0x6a   :  { %3424 = vmatmul.mubr.msk.f32.vlgmr.msra.gmra.mxu0 %vm152_vm0, %v143_v11  ;;  %3448 = vmatprep.subr.mxu1 %v3911_v12  ;;  %p3870_p12 = scmp.ne.s32.totalorder %s3255_s17, %s3869_s18  ;;  %p3875_p0 = scmp.lt.s32.totalorder %s3869_s18, %s3869_s18 }
  0x6b   :  { %3450 = vmatprep.mubr.msk.f32.mxu1 %vm3912_vm1, %v3911_v12  ;;  %3437 = vmatprep.subr.mxu0 %v322_v13 }
  0x6c   :  { %3438 = vmatpush3.msra.mxu0 %v322_v13  ;;  %3445 = vmatprep.mubr.msk.f32.mxu0 %vm152_vm0, %v146_v17  ;;  %p3876_p1 = por %p3875_p0, %p3874_p13 }
  0x6d   :  { %3439 = vmatprep.subr.mxu0 %v321_v14 }
  0x6e   :  { %3440 = vmatpush3.msra.mxu0 %v321_v14  ;;  %p3877_p2 = pnand %p3876_p1, %p3870_p12 }
  0x6f   :  { %3441 = vmatprep.subr.mxu0 %v320_v15 }
  0x70   :  { %3442 = vmatpush3.msra.mxu0 %v320_v15 }
  0x71   :  { %3443 = vmatprep.subr.mxu0 %v319_v16 }
  0x72   :  { %3444 = vmatpush3.msra.mxu0 %v319_v16 }
  0x73   :  { %3468 = vmatprep.subr.mxu0 %v3911_v12  ;;  %3446 = vmatmul.mubr.msk.f32.vlgmr.msra.gmra.mxu0 %vm152_vm0, %v147_v18 }
  0x74   :  { %3470 = vmatprep.mubr.msk.f32.mxu0 %vm3912_vm1, %v3911_v12 }
 0x128   :  { %v4037_v19 = vpop.f32.mrf.mxu1 }
 0x12a   :  { %v4039_v20 = vpop.f32.mrf.mxu0  ;;  %v4041_v21 = vpop.f32.mrf.mxu1 }
 0x12b   :  { %738 = vrot.lane.b32.xlu1 %v4041_v21, %s3913_s6  ;;  %3449 = vmatpush3.xpose.msk.msra.mxu1 %vm408_vm2, %v4041_v21 }
 0x12c   :  { %3453 = vmatprep.subr.mxu1 %v3911_v12  ;;  %v4048_v22 = vpop.f32.mrf.mxu0 }
 0x12e   :  { %3451 = vmatmul.mubr.msk.f32.vlgmr.msra.gmra.mxu1 %vm408_vm2, %v4048_v22 }
 0x12f   :  { %816 = vrot.lane.b32.xlu1 %v4037_v19, %s3913_s6  ;;  %3454 = vmatpush3.xpose.msk.msra.mxu1 %vm408_vm2, %v4037_v19 }
 0x130   :  { %3455 = vmatprep.mubr.msk.f32.mxu1 %vm3912_vm1, %v3911_v12  ;;  %3458 = vmatprep.subr.mxu1 %v3911_v12 }
 0x132   :  { %3456 = vmatmul.mubr.msk.f32.vlgmr.msra.gmra.mxu1 %vm408_vm2, %v4039_v20 }
 0x133   :  { %814 = vrot.lane.b32.xlu1 %v4039_v20, %s3913_s6  ;;  %3460 = vmatprep.mubr.msk.f32.mxu1 %vm3912_vm1, %v3911_v12  ;;  %v4079_v36 = vpop.f32.mrf.mxu0 }
 0x135   :  { %v4081_v37 = vpop.f32.mrf.mxu0 }
 0x136   :  { %3459 = vmatpush3.msra.mxu1 %v4081_v37 }
 0x137   :  { %915 = vrot.lane.b32.xlu1 %v4081_v37, %s3913_s6  ;;  %3463 = vmatprep.subr.mxu1 %v3911_v12 }
 0x19d   :  { %v739_v23 = vpop.permute.xlu1 %738 }
 0x19e   :  { %3469 = vmatpush3.xpose.msk.msra.mxu0 %vm408_vm2, %v739_v23 }
 0x19f   :  { %3478 = vmatprep.subr.mxu0 %v3911_v12 }
 0x1a1   :  { %v817_v38 = vpop.permute.xlu1 %816 }
 0x1a5   :  { %v815_v41 = vpop.permute.xlu1 %814 }
 0x1a9   :  { %v916_v46 = vpop.permute.xlu1 %915 }
 0x1ee   :  { %v481_v26 = vpop.f32.mrf.mxu1 }
 0x1ef   :  { %v561_v27 = vsel %vm406_vm3, %v481_v26, -1e+20 }
 0x1f0   :  { %v563_v28 = vmul.f32 0.17677669, %v561_v27  ;;  %v3452_v29 = vpop.f32.mrf.mxu1 }
 0x1f2   :  { %v557_v30 = vpop.f32.mrf.mxu1  ;;  %v566_v31 = vsel %vm565_vm4, %v563_v28, -inf }
 0x1f3   :  { %v562_v32 = vsel %vm407_vm5, %v557_v30, -1e+20  ;;  %567 = vmax.xlane.f32.xlu0 %v566_v31 }
 0x1f4   :  { %v564_v33 = vmul.f32 0.17677669, %v562_v32  ;;  %v3457_v34 = vpop.f32.mrf.mxu1 }
 0x1f6   :  { %v569_v35 = vsel %vm565_vm4, %v564_v33, -inf }
 0x1f7   :  { %570 = vmax.xlane.f32.xlu0 %v569_v35 }
 0x20d   :  { %736 = vrot.lane.b32.xlu0 %v4048_v22, %s3913_s6 }
 0x27c   :  { %v568_v39 = vpop.xlane.xlu0 %567 }
 0x27d   :  { %v572_v40 = vsub.f32 %v563_v28, %v568_v39 }
 0x27f   :  { %v574_v42 = vmul.f32 1.442695, %v572_v40 }
 0x280   :  { %v571_v43 = vpop.xlane.xlu0 %570 }
 0x281   :  { %3645 = vpow2.f32 %v574_v42  ;;  %v573_v44 = vsub.f32 %v564_v33, %v571_v43 }
 0x283   :  { %v576_v45 = vmul.f32 1.442695, %v573_v44 }
 0x284   :  { %v737_v47 = vpop.permute.xlu0 %736 }
 0x285   :  { %3647 = vpow2.f32 %v576_v45  ;;  %3471 = vmatmul.mubr.msk.f32.vlgmr.msra.gmra.mxu0 %vm408_vm2, %v737_v47 }
 0x286   :  { %3479 = vmatpush3.msra.mxu0 %v916_v46  ;;  %3480 = vmatprep.mubr.msk.f32.mxu0 %vm3912_vm1, %v3911_v12 }
 0x287   :  { %3488 = vmatprep.subr.mxu0 %v3911_v12 }
 0x28e   :  { %v4093_v48 = vpop.eup %3645 }
 0x28f   :  { %3461 = vmatmul.mubr.msk.f32.vlgmr.msra.gmra.mxu1 %vm565_vm4, %v4093_v48 }
 0x290   :  { %3464 = vmatpush3.msra.mxu1 %v4079_v36  ;;  %3465 = vmatprep.mubr.msk.f32.mxu1 %vm3912_vm1, %v3911_v12 }
 0x291   :  { %3473 = vmatprep.subr.mxu1 %v3911_v12 }
 0x292   :  { %v4101_v49 = vpop.eup %3647 }
 0x293   :  { %3466 = vmatmul.mubr.msk.f32.vlgmr.msra.gmra.mxu1 %vm565_vm4, %v4101_v49 }
 0x294   :  { %3474 = vmatpush3.xpose.msk.msra.mxu1 %vm408_vm2, %v817_v38  ;;  %3475 = vmatprep.mubr.msk.f32.mxu1 %vm3912_vm1, %v3911_v12 }
 0x295   :  { %3483 = vmatprep.subr.mxu1 %v3911_v12 }
 0x297   :  { %3476 = vmatmul.mubr.msk.f32.vlgmr.msra.gmra.mxu1 %vm408_vm2, %v815_v41 }
 0x298   :  { %3485 = vmatprep.mubr.msk.f32.mxu1 %vm3912_vm1, %v3911_v12 }
 0x345   :  { %v810_v50 = vpop.f32.mrf.mxu0 }
 0x346   :  { %v892_v51 = vsel %vm406_vm3, %v810_v50, -1e+20 }
 0x347   :  { %v894_v52 = vmul.f32 0.17677669, %v892_v51  ;;  %v3472_v53 = vpop.f32.mrf.mxu0 }
 0x349   :  { %v896_v54 = vsel %vm565_vm4, %v894_v52, -inf }
 0x34a   :  { %897 = vmax.xlane.f32.xlu1 %v896_v54 }
 0x34f   :  { %v4115_v55 = vpop.f32.mrf.mxu1 }
 0x351   :  { %v3462_v56 = vpop.f32.mrf.mxu1 }
 0x353   :  { %v4117_v57 = vpop.f32.mrf.mxu1 }
 0x355   :  { %v3467_v58 = vpop.f32.mrf.mxu1 }
 0x357   :  { %v888_v59 = vpop.f32.mrf.mxu1 }
 0x358   :  { %v893_v60 = vsel %vm407_vm5, %v888_v59, -1e+20 }
 0x359   :  { %v895_v61 = vmul.f32 0.17677669, %v893_v60  ;;  %v3477_v62 = vpop.f32.mrf.mxu1 }
 0x35b   :  { %1085 = vrot.lane.b32.xlu1 %v4041_v21, %s3914_s7  ;;  %v899_v63 = vsel %vm565_vm4, %v895_v61, -inf }
 0x35c   :  { %900 = vmax.xlane.f32.xlu0 %v899_v63 }
 0x35f   :  { %1163 = vrot.lane.b32.xlu1 %v4037_v19, %s3914_s7 }
 0x363   :  { %1083 = vrot.lane.b32.xlu1 %v4048_v22, %s3914_s7 }
 0x367   :  { %1161 = vrot.lane.b32.xlu1 %v4039_v20, %s3914_s7 }
 0x36b   :  { %1337 = vrot.lane.b32.xlu1 %v4079_v36, %s3914_s7 }
 0x36f   :  { %1430 = vrot.lane.b32.xlu1 %v4041_v21, %s3915_s25 }
 0x372   :  { %992 = vrot.lane.b32.xlu0 %v4079_v36, %s3913_s6 }
 0x376   :  { %1261 = vrot.lane.b32.xlu0 %v4081_v37, %s3914_s7 }
 0x3d3   :  { %v898_v0 = vpop.xlane.xlu1 %897 }
 0x3d4   :  { %v902_v1 = vsub.f32 %v894_v52, %v898_v0 }
 0x3d6   :  { %v904_v2 = vmul.f32 1.442695, %v902_v1 }
 0x3d7   :  { %v1086_v3 = vpop.permute.xlu1 %1085 }
 0x3d8   :  { %3649 = vpow2.f32 %v904_v2 }
 0x3db   :  { %v1164_v4 = vpop.permute.xlu1 %1163 }
 0x3df   :  { %v1084_v9 = vpop.permute.xlu1 %1083 }
 0x3e3   :  { %v1162_v13 = vpop.permute.xlu1 %1161 }
 0x3e5   :  { %v4132_v5 = vpop.eup %3649  ;;  %v901_v6 = vpop.xlane.xlu0 %900 }
 0x3e6   :  { %v903_v7 = vsub.f32 %v895_v61, %v901_v6  ;;  %3481 = vmatmul.mubr.msk.f32.vlgmr.msra.gmra.mxu0 %vm565_vm4, %v4132_v5 }
 0x3e7   :  { %3489 = vmatpush3.xpose.msk.msra.mxu0 %vm408_vm2, %v1086_v3  ;;  %3490 = vmatprep.mubr.msk.f32.mxu0 %vm3912_vm1, %v3911_v12  ;;  %v1338_v15 = vpop.permute.xlu1 %1337 }
 0x3e8   :  { %v906_v8 = vmul.f32 1.442695, %v903_v7  ;;  %3498 = vmatprep.subr.mxu0 %v3911_v12 }
 0x3e9   :  { %v993_v10 = vpop.permute.xlu0 %992 }
 0x3ea   :  { %3651 = vpow2.f32 %v906_v8  ;;  %3484 = vmatpush3.msra.mxu1 %v993_v10  ;;  %3491 = vmatmul.mubr.msk.f32.vlgmr.msra.gmra.mxu0 %vm408_vm2, %v1084_v9 }
 0x3eb   :  { %3493 = vmatprep.subr.mxu1 %v3911_v12  ;;  %3500 = vmatprep.mubr.msk.f32.mxu0 %vm3912_vm1, %v3911_v12  ;;  %v1431_v38 = vpop.permute.xlu1 %1430 }
 0x3ed   :  { %v1262_v11 = vpop.permute.xlu0 %1261 }
 0x3ee   :  { %3499 = vmatpush3.msra.mxu0 %v1262_v11 }
 0x3ef   :  { %3508 = vmatprep.subr.mxu0 %v3911_v12 }
 0x3f7   :  { %v4145_v14 = vpop.eup %3651 }
 0x3f8   :  { %3486 = vmatmul.mubr.msk.f32.vlgmr.msra.gmra.mxu1 %vm565_vm4, %v4145_v14 }
 0x3f9   :  { %3494 = vmatpush3.xpose.msk.msra.mxu1 %vm408_vm2, %v1164_v4  ;;  %3495 = vmatprep.mubr.msk.f32.mxu1 %vm3912_vm1, %v3911_v12 }
 0x3fa   :  { %3503 = vmatprep.subr.mxu1 %v3911_v12 }
 0x3fc   :  { %3496 = vmatmul.mubr.msk.f32.vlgmr.msra.gmra.mxu1 %vm408_vm2, %v1162_v13 }
 0x3fd   :  { %3504 = vmatpush3.msra.mxu1 %v1338_v15  ;;  %3505 = vmatprep.mubr.msk.f32.mxu1 %vm3912_vm1, %v3911_v12 }
 0x3fe   :  { %3513 = vmatprep.subr.mxu1 %v3911_v12 }
 0x4a6   :  { %v4157_v16 = vpop.f32.mrf.mxu0 }
 0x4a8   :  { %v3482_v17 = vpop.f32.mrf.mxu0 }
 0x4aa   :  { %v1157_v18 = vpop.f32.mrf.mxu0 }
 0x4ab   :  { %v1239_v23 = vsel %vm406_vm3, %v1157_v18, -1e+20 }
 0x4ac   :  { %v1241_v26 = vmul.f32 0.17677669, %v1239_v23  ;;  %v3492_v27 = vpop.f32.mrf.mxu0 }
 0x4ae   :  { %v1243_v28 = vsel %vm565_vm4, %v1241_v26, -inf }
 0x4af   :  { %1244 = vmax.xlane.f32.xlu1 %v1243_v28 }
 0x4b8   :  { %v4162_v29 = vpop.f32.mrf.mxu1 }
 0x4ba   :  { %v3487_v30 = vpop.f32.mrf.mxu1 }
 0x4bc   :  { %v1235_v31 = vpop.f32.mrf.mxu1 }
 0x4bd   :  { %v1240_v32 = vsel %vm407_vm5, %v1235_v31, -1e+20 }
 0x4be   :  { %v1242_v33 = vmul.f32 0.17677669, %v1240_v32  ;;  %v3497_v34 = vpop.f32.mrf.mxu1 }
 0x4c0   :  { %1428 = vrot.lane.b32.xlu1 %v4048_v22, %s3915_s25  ;;  %v1246_v35 = vsel %vm565_vm4, %v1242_v33, -inf }
 0x4c1   :  { %1247 = vmax.xlane.f32.xlu0 %v1246_v35 }
 0x4c4   :  { %1682 = vrot.lane.b32.xlu1 %v4079_v36, %s3915_s25 }
 0x4c8   :  { %1775 = vrot.lane.b32.xlu1 %v4041_v21, %s3916_s26 }
 0x4d7   :  { %1508 = vrot.lane.b32.xlu0 %v4037_v19, %s3915_s25 }
 0x4db   :  { %1506 = vrot.lane.b32.xlu0 %v4039_v20, %s3915_s25 }
 0x4df   :  { %1606 = vrot.lane.b32.xlu0 %v4081_v37, %s3915_s25 }
 0x538   :  { %v1245_v39 = vpop.xlane.xlu1 %1244 }
 0x539   :  { %v1249_v40 = vsub.f32 %v1241_v26, %v1245_v39 }
 0x53b   :  { %v1251_v41 = vmul.f32 1.442695, %v1249_v40 }
 0x53c   :  { %v1429_v46 = vpop.permute.xlu1 %1428 }
 0x53d   :  { %3653 = vpow2.f32 %v1251_v41 }
 0x540   :  { %v1683_v53 = vpop.permute.xlu1 %1682 }
 0x544   :  { %v1776_v7 = vpop.permute.xlu1 %1775 }
 0x54a   :  { %v4179_v42 = vpop.eup %3653  ;;  %v1248_v43 = vpop.xlane.xlu0 %1247 }
 0x54b   :  { %v1250_v44 = vsub.f32 %v1242_v33, %v1248_v43  ;;  %3501 = vmatmul.mubr.msk.f32.vlgmr.msra.gmra.mxu0 %vm565_vm4, %v4179_v42 }
 0x54c   :  { %3509 = vmatpush3.xpose.msk.msra.mxu0 %vm408_vm2, %v1431_v38  ;;  %3510 = vmatprep.mubr.msk.f32.mxu0 %vm3912_vm1, %v3911_v12 }
 0x54d   :  { %v1253_v45 = vmul.f32 1.442695, %v1250_v44  ;;  %3518 = vmatprep.subr.mxu0 %v3911_v12 }
 0x54e   :  { %v1509_v47 = vpop.permute.xlu0 %1508 }
 0x54f   :  { %3655 = vpow2.f32 %v1253_v45  ;;  %3511 = vmatmul.mubr.msk.f32.vlgmr.msra.gmra.mxu0 %vm408_vm2, %v1429_v46 }
 0x550   :  { %3520 = vmatprep.mubr.msk.f32.mxu0 %vm3912_vm1, %v3911_v12 }
 0x552   :  { %v1507_v50 = vpop.permute.xlu0 %1506 }
 0x556   :  { %v1607_v51 = vpop.permute.xlu0 %1606 }
 0x557   :  { %3519 = vmatpush3.msra.mxu0 %v1607_v51 }
 0x558   :  { %3528 = vmatprep.subr.mxu0 %v3911_v12 }
 0x55c   :  { %v4191_v52 = vpop.eup %3655 }
 0x55d   :  { %3506 = vmatmul.mubr.msk.f32.vlgmr.msra.gmra.mxu1 %vm565_vm4, %v4191_v52 }
 0x55e   :  { %3514 = vmatpush3.xpose.msk.msra.mxu1 %vm408_vm2, %v1509_v47  ;;  %3515 = vmatprep.mubr.msk.f32.mxu1 %vm3912_vm1, %v3911_v12 }
 0x55f   :  { %3523 = vmatprep.subr.mxu1 %v3911_v12 }
 0x561   :  { %3516 = vmatmul.mubr.msk.f32.vlgmr.msra.gmra.mxu1 %vm408_vm2, %v1507_v50 }
 0x562   :  { %3524 = vmatpush3.msra.mxu1 %v1683_v53  ;;  %3525 = vmatprep.mubr.msk.f32.mxu1 %vm3912_vm1, %v3911_v12 }
 0x563   :  { %3533 = vmatprep.subr.mxu1 %v3911_v12 }
 0x60b   :  { %v4203_v54 = vpop.f32.mrf.mxu0 }
 0x60d   :  { %v3502_v56 = vpop.f32.mrf.mxu0 }
 0x60f   :  { %v1502_v58 = vpop.f32.mrf.mxu0 }
 0x610   :  { %v1584_v59 = vsel %vm406_vm3, %v1502_v58, -1e+20 }
 0x611   :  { %v1586_v60 = vmul.f32 0.17677669, %v1584_v59  ;;  %v3512_v61 = vpop.f32.mrf.mxu0 }
 0x613   :  { %v1588_v62 = vsel %vm565_vm4, %v1586_v60, -inf }
 0x614   :  { %1589 = vmax.xlane.f32.xlu1 %v1588_v62 }
 0x61d   :  { %v4208_v63 = vpop.f32.mrf.mxu1 }
 0x61f   :  { %v3507_v0 = vpop.f32.mrf.mxu1 }
 0x621   :  { %v1580_v1 = vpop.f32.mrf.mxu1 }
 0x622   :  { %v1585_v2 = vsel %vm407_vm5, %v1580_v1, -1e+20 }
 0x623   :  { %v1587_v3 = vmul.f32 0.17677669, %v1585_v2  ;;  %v3517_v4 = vpop.f32.mrf.mxu1 }
 0x625   :  { %1773 = vrot.lane.b32.xlu1 %v4048_v22, %s3916_s26  ;;  %v1591_v6 = vsel %vm565_vm4, %v1587_v3, -inf }
 0x626   :  { %1592 = vmax.xlane.f32.xlu0 %v1591_v6 }
 0x629   :  { %2027 = vrot.lane.b32.xlu1 %v4079_v36, %s3916_s26 }
 0x62d   :  { %2120 = vrot.lane.b32.xlu1 %v4041_v21, %s3917_s3 }
 0x63c   :  { %1853 = vrot.lane.b32.xlu0 %v4037_v19, %s3916_s26 }
 0x640   :  { %1851 = vrot.lane.b32.xlu0 %v4039_v20, %s3916_s26 }
 0x644   :  { %1951 = vrot.lane.b32.xlu0 %v4081_v37, %s3916_s26 }
 0x69d   :  { %v1590_v8 = vpop.xlane.xlu1 %1589 }
 0x69e   :  { %v1594_v9 = vsub.f32 %v1586_v60, %v1590_v8 }
 0x6a0   :  { %v1596_v10 = vmul.f32 1.442695, %v1594_v9 }
 0x6a1   :  { %v1774_v18 = vpop.permute.xlu1 %1773 }
 0x6a2   :  { %3657 = vpow2.f32 %v1596_v10 }
 0x6a5   :  { %v2028_v30 = vpop.permute.xlu1 %2027 }
 0x6a9   :  { %v2121_v50 = vpop.permute.xlu1 %2120 }
 0x6af   :  { %v4225_v11 = vpop.eup %3657  ;;  %v1593_v13 = vpop.xlane.xlu0 %1592 }
 0x6b0   :  { %v1595_v15 = vsub.f32 %v1587_v3, %v1593_v13  ;;  %3521 = vmatmul.mubr.msk.f32.vlgmr.msra.gmra.mxu0 %vm565_vm4, %v4225_v11 }
 0x6b1   :  { %3529 = vmatpush3.xpose.msk.msra.mxu0 %vm408_vm2, %v1776_v7  ;;  %3530 = vmatprep.mubr.msk.f32.mxu0 %vm3912_vm1, %v3911_v12 }
 0x6b2   :  { %v1598_v17 = vmul.f32 1.442695, %v1595_v15  ;;  %3538 = vmatprep.subr.mxu0 %v3911_v12 }
 0x6b3   :  { %v1854_v23 = vpop.permute.xlu0 %1853 }
 0x6b4   :  { %3659 = vpow2.f32 %v1598_v17  ;;  %3531 = vmatmul.mubr.msk.f32.vlgmr.msra.gmra.mxu0 %vm408_vm2, %v1774_v18 }
 0x6b5   :  { %3540 = vmatprep.mubr.msk.f32.mxu0 %vm3912_vm1, %v3911_v12 }
 0x6b7   :  { %v1852_v26 = vpop.permute.xlu0 %1851 }
 0x6bb   :  { %v1952_v27 = vpop.permute.xlu0 %1951 }
 0x6bc   :  { %3539 = vmatpush3.msra.mxu0 %v1952_v27 }
 0x6bd   :  { %3548 = vmatprep.subr.mxu0 %v3911_v12 }
 0x6c1   :  { %v4237_v28 = vpop.eup %3659 }
 0x6c2   :  { %3526 = vmatmul.mubr.msk.f32.vlgmr.msra.gmra.mxu1 %vm565_vm4, %v4237_v28  ;;  %v1603_v25 = vsel %vm565_vm4, %v4237_v28, 0.0  ;;  %v1600_v28 = vsel %vm565_vm4, %v4225_v11, 0.0 }
 0x6c3   :  { %3534 = vmatpush3.xpose.msk.msra.mxu1 %vm408_vm2, %v1854_v23  ;;  %3535 = vmatprep.mubr.msk.f32.mxu1 %vm3912_vm1, %v3911_v12 }
 0x6c4   :  { %3543 = vmatprep.subr.mxu1 %v3911_v12 }
 0x6c6   :  { %3536 = vmatmul.mubr.msk.f32.vlgmr.msra.gmra.mxu1 %vm408_vm2, %v1852_v26 }
 0x6c7   :  { %3544 = vmatpush3.msra.mxu1 %v2028_v30  ;;  %3545 = vmatprep.mubr.msk.f32.mxu1 %vm3912_vm1, %v3911_v12 }
 0x6c8   :  { %3553 = vmatprep.subr.mxu1 %v3911_v12 }
 0x770   :  { %v4249_v31 = vpop.f32.mrf.mxu0 }
 0x772   :  { %v3522_v32 = vpop.f32.mrf.mxu0 }
 0x774   :  { %v1847_v33 = vpop.f32.mrf.mxu0 }
 0x775   :  { %v1929_v34 = vsel %vm406_vm3, %v1847_v33, -1e+20 }
 0x776   :  { %v1931_v35 = vmul.f32 0.17677669, %v1929_v34  ;;  %v3532_v38 = vpop.f32.mrf.mxu0 }
 0x778   :  { %v1933_v39 = vsel %vm565_vm4, %v1931_v35, -inf }
 0x779   :  { %1934 = vmax.xlane.f32.xlu1 %v1933_v39 }
 0x782   :  { %v4254_v40 = vpop.f32.mrf.mxu1 }
 0x784   :  { %v3527_v41 = vpop.f32.mrf.mxu1 }
 0x786   :  { %v1925_v43 = vpop.f32.mrf.mxu1 }
 0x787   :  { %v1930_v44 = vsel %vm407_vm5, %v1925_v43, -1e+20 }
 0x788   :  { %v1932_v45 = vmul.f32 0.17677669, %v1930_v44  ;;  %v3537_v46 = vpop.f32.mrf.mxu1 }
 0x78a   :  { %2118 = vrot.lane.b32.xlu1 %v4048_v22, %s3917_s3  ;;  %v1936_v47 = vsel %vm565_vm4, %v1932_v45, -inf }
 0x78b   :  { %1937 = vmax.xlane.f32.xlu0 %v1936_v47 }
 0x78e   :  { %2372 = vrot.lane.b32.xlu1 %v4079_v36, %s3917_s3 }
 0x792   :  { %2465 = vrot.lane.b32.xlu1 %v4041_v21, %s3918_s27 }
 0x7a1   :  { %2198 = vrot.lane.b32.xlu0 %v4037_v19, %s3917_s3 }
 0x7a5   :  { %2196 = vrot.lane.b32.xlu0 %v4039_v20, %s3917_s3 }
 0x7a9   :  { %2296 = vrot.lane.b32.xlu0 %v4081_v37, %s3917_s3 }
 0x802   :  { %v1935_v51 = vpop.xlane.xlu1 %1934 }
 0x803   :  { %v1939_v53 = vsub.f32 %v1931_v35, %v1935_v51 }
 0x805   :  { %v1941_v56 = vmul.f32 1.442695, %v1939_v53 }
 0x806   :  { %v2119_v62 = vpop.permute.xlu1 %2118 }
 0x807   :  { %3661 = vpow2.f32 %v1941_v56 }
 0x80a   :  { %v2373_v4 = vpop.permute.xlu1 %2372 }
 0x80e   :  { %v2466_v33 = vpop.permute.xlu1 %2465 }
 0x814   :  { %v4271_v58 = vpop.eup %3661  ;;  %v1938_v59 = vpop.xlane.xlu0 %1937 }
 0x815   :  { %v1940_v60 = vsub.f32 %v1932_v45, %v1938_v59  ;;  %3541 = vmatmul.mubr.msk.f32.vlgmr.msra.gmra.mxu0 %vm565_vm4, %v4271_v58 }
 0x816   :  { %3549 = vmatpush3.xpose.msk.msra.mxu0 %vm408_vm2, %v2121_v50  ;;  %3550 = vmatprep.mubr.msk.f32.mxu0 %vm3912_vm1, %v3911_v12 }
 0x817   :  { %v1943_v61 = vmul.f32 1.442695, %v1940_v60  ;;  %3558 = vmatprep.subr.mxu0 %v3911_v12 }
 0x818   :  { %v2199_v0 = vpop.permute.xlu0 %2198 }
 0x819   :  { %3663 = vpow2.f32 %v1943_v61  ;;  %3551 = vmatmul.mubr.msk.f32.vlgmr.msra.gmra.mxu0 %vm408_vm2, %v2119_v62 }
 0x81a   :  { %3560 = vmatprep.mubr.msk.f32.mxu0 %vm3912_vm1, %v3911_v12 }
 0x81c   :  { %v2197_v1 = vpop.permute.xlu0 %2196 }
 0x820   :  { %v2297_v2 = vpop.permute.xlu0 %2296 }
 0x821   :  { %3559 = vmatpush3.msra.mxu0 %v2297_v2 }
 0x822   :  { %3568 = vmatprep.subr.mxu0 %v3911_v12 }
 0x826   :  { %v4283_v3 = vpop.eup %3663 }
 0x827   :  { %3546 = vmatmul.mubr.msk.f32.vlgmr.msra.gmra.mxu1 %vm565_vm4, %v4283_v3 }
 0x828   :  { %3554 = vmatpush3.xpose.msk.msra.mxu1 %vm408_vm2, %v2199_v0  ;;  %3555 = vmatprep.mubr.msk.f32.mxu1 %vm3912_vm1, %v3911_v12 }
 0x829   :  { %3563 = vmatprep.subr.mxu1 %v3911_v12 }
 0x82b   :  { %3556 = vmatmul.mubr.msk.f32.vlgmr.msra.gmra.mxu1 %vm408_vm2, %v2197_v1 }
 0x82c   :  { %3564 = vmatpush3.msra.mxu1 %v2373_v4  ;;  %3565 = vmatprep.mubr.msk.f32.mxu1 %vm3912_vm1, %v3911_v12 }
 0x82d   :  { %3573 = vmatprep.subr.mxu1 %v3911_v12 }
 0x8d5   :  { %v4295_v6 = vpop.f32.mrf.mxu0 }
 0x8d7   :  { %v3542_v7 = vpop.f32.mrf.mxu0 }
 0x8d9   :  { %v2192_v8 = vpop.f32.mrf.mxu0 }
 0x8da   :  { %v2274_v9 = vsel %vm406_vm3, %v2192_v8, -1e+20 }
 0x8db   :  { %v2276_v10 = vmul.f32 0.17677669, %v2274_v9  ;;  %v3552_v13 = vpop.f32.mrf.mxu0 }
 0x8dd   :  { %v2278_v15 = vsel %vm565_vm4, %v2276_v10, -inf }
 0x8de   :  { %2279 = vmax.xlane.f32.xlu1 %v2278_v15 }
 0x8e7   :  { %v4300_v17 = vpop.f32.mrf.mxu1 }
 0x8e9   :  { %v3547_v18 = vpop.f32.mrf.mxu1 }
 0x8eb   :  { %v2270_v23 = vpop.f32.mrf.mxu1 }
 0x8ec   :  { %v2275_v26 = vsel %vm407_vm5, %v2270_v23, -1e+20 }
 0x8ed   :  { %v2277_v27 = vmul.f32 0.17677669, %v2275_v26  ;;  %v3557_v30 = vpop.f32.mrf.mxu1 }
 0x8ef   :  { %2463 = vrot.lane.b32.xlu1 %v4048_v22, %s3918_s27  ;;  %v2281_v32 = vsel %vm565_vm4, %v2277_v27, -inf }
 0x8f0   :  { %2282 = vmax.xlane.f32.xlu0 %v2281_v32 }
 0x8f3   :  { %2717 = vrot.lane.b32.xlu1 %v4079_v36, %s3918_s27 }
 0x8f7   :  { %2810 = vrot.lane.b32.xlu1 %v4041_v21, %s3919_s28 }
 0x906   :  { %2543 = vrot.lane.b32.xlu0 %v4037_v19, %s3918_s27 }
 0x90a   :  { %2541 = vrot.lane.b32.xlu0 %v4039_v20, %s3918_s27 }
 0x90e   :  { %2641 = vrot.lane.b32.xlu0 %v4081_v37, %s3918_s27 }
 0x967   :  { %v2280_v34 = vpop.xlane.xlu1 %2279 }
 0x968   :  { %v2284_v35 = vsub.f32 %v2276_v10, %v2280_v34 }
 0x96a   :  { %v2286_v38 = vmul.f32 1.442695, %v2284_v35 }
 0x96b   :  { %v2464_v44 = vpop.permute.xlu1 %2463 }
 0x96c   :  { %3665 = vpow2.f32 %v2286_v38 }
 0x96f   :  { %v2718_v51 = vpop.permute.xlu1 %2717 }
 0x973   :  { %v2811_v13 = vpop.permute.xlu1 %2810 }
 0x979   :  { %v4317_v39 = vpop.eup %3665  ;;  %v2283_v41 = vpop.xlane.xlu0 %2282 }
 0x97a   :  { %v2285_v43 = vsub.f32 %v2277_v27, %v2283_v41  ;;  %3561 = vmatmul.mubr.msk.f32.vlgmr.msra.gmra.mxu0 %vm565_vm4, %v4317_v39 }
 0x97b   :  { %3569 = vmatpush3.xpose.msk.msra.mxu0 %vm408_vm2, %v2466_v33  ;;  %3570 = vmatprep.mubr.msk.f32.mxu0 %vm3912_vm1, %v3911_v12 }
 0x97c   :  { %v2288_v21 = vmul.f32 1.442695, %v2285_v43  ;;  %3578 = vmatprep.subr.mxu0 %v3911_v12 }
 0x97d   :  { %v2544_v45 = vpop.permute.xlu0 %2543 }
 0x97e   :  { %3667 = vpow2.f32 %v2288_v21  ;;  %3571 = vmatmul.mubr.msk.f32.vlgmr.msra.gmra.mxu0 %vm408_vm2, %v2464_v44 }
 0x97f   :  { %3580 = vmatprep.mubr.msk.f32.mxu0 %vm3912_vm1, %v3911_v12 }
 0x981   :  { %v2542_v46 = vpop.permute.xlu0 %2541 }
 0x985   :  { %v2642_v47 = vpop.permute.xlu0 %2641 }
 0x986   :  { %3579 = vmatpush3.msra.mxu0 %v2642_v47 }
 0x987   :  { %3588 = vmatprep.subr.mxu0 %v3911_v12 }
 0x98b   :  { %v4329_v50 = vpop.eup %3667 }
 0x98c   :  { %3566 = vmatmul.mubr.msk.f32.vlgmr.msra.gmra.mxu1 %vm565_vm4, %v4329_v50 }
 0x98d   :  { %3574 = vmatpush3.xpose.msk.msra.mxu1 %vm408_vm2, %v2544_v45  ;;  %3575 = vmatprep.mubr.msk.f32.mxu1 %vm3912_vm1, %v3911_v12 }
 0x98e   :  { %3583 = vmatprep.subr.mxu1 %v3911_v12 }
 0x990   :  { %3576 = vmatmul.mubr.msk.f32.vlgmr.msra.gmra.mxu1 %vm408_vm2, %v2542_v46 }
 0x991   :  { %3584 = vmatpush3.msra.mxu1 %v2718_v51  ;;  %3585 = vmatprep.mubr.msk.f32.mxu1 %vm3912_vm1, %v3911_v12 }
 0x992   :  { %3593 = vmatprep.subr.mxu1 %v3911_v12 }
 0xa3a   :  { %v4341_v53 = vpop.f32.mrf.mxu0 }
 0xa3c   :  { %v3562_v56 = vpop.f32.mrf.mxu0 }
 0xa3e   :  { %v2537_v59 = vpop.f32.mrf.mxu0 }
 0xa3f   :  { %v2619_v60 = vsel %vm406_vm3, %v2537_v59, -1e+20  ;;  %v908_v59 = vsel %vm565_vm4, %v4132_v5, 0.0 }
 0xa40   :  { %v2621_v61 = vmul.f32 0.17677669, %v2619_v60  ;;  %v3572_v62 = vpop.f32.mrf.mxu0  ;;  %v1258_v60 = vsel %vm565_vm4, %v4191_v52, 0.0  ;;  %v1255_v52 = vsel %vm565_vm4, %v4179_v42, 0.0 }
 0xa42   :  { %v2623_v0 = vsel %vm565_vm4, %v2621_v61, -inf }
 0xa43   :  { %2624 = vmax.xlane.f32.xlu1 %v2623_v0 }
 0xa4c   :  { %v4346_v1 = vpop.f32.mrf.mxu1 }
 0xa4e   :  { %v3567_v2 = vpop.f32.mrf.mxu1 }
 0xa50   :  { %v2615_v4 = vpop.f32.mrf.mxu1 }
 0xa51   :  { %v2620_v7 = vsel %vm407_vm5, %v2615_v4, -1e+20 }
 0xa52   :  { %v2622_v8 = vmul.f32 0.17677669, %v2620_v7  ;;  %v3577_v9 = vpop.f32.mrf.mxu1 }
 0xa54   :  { %2808 = vrot.lane.b32.xlu1 %v4048_v22, %s3919_s28  ;;  %v2626_v10 = vsel %vm565_vm4, %v2622_v8, -inf }
 0xa55   :  { %2627 = vmax.xlane.f32.xlu0 %v2626_v10 }
 0xa6b   :  { %2888 = vrot.lane.b32.xlu0 %v4037_v19, %s3919_s28 }
 0xa6f   :  { %2886 = vrot.lane.b32.xlu0 %v4039_v20, %s3919_s28 }
 0xacc   :  { %v2625_v15 = vpop.xlane.xlu1 %2624 }
 0xacd   :  { %v2629_v18 = vsub.f32 %v2621_v61, %v2625_v15  ;;  %v2293_v61 = vsel %vm565_vm4, %v4329_v50, 0.0  ;;  %v2290_v50 = vsel %vm565_vm4, %v4317_v39, 0.0  ;;  %v578_v39 = vsel %vm565_vm4, %v4093_v48, 0.0 }
 0xace   :  { %v581_v15 = vsel %vm565_vm4, %v4101_v49, 0.0 }
 0xacf   :  { %v2631_v23 = vmul.f32 1.442695, %v2629_v18 }
 0xad0   :  { %v2809_v19 = vpop.permute.xlu1 %2808 }
 0xad1   :  { %3669 = vpow2.f32 %v2631_v23 }
 0xade   :  { %v3670_v26 = vpop.eup %3669  ;;  %v2628_v27 = vpop.xlane.xlu0 %2627 }
 0xadf   :  { %v2630_v30 = vsub.f32 %v2622_v8, %v2628_v27  ;;  %3581 = vmatmul.mubr.msk.f32.vlgmr.msra.gmra.mxu0 %vm565_vm4, %v3670_v26 }
 0xae0   :  { %3589 = vmatpush3.xpose.msk.msra.mxu0 %vm408_vm2, %v2811_v13  ;;  %3590 = vmatprep.mubr.msk.f32.mxu0 %vm3912_vm1, %v3911_v12 }
 0xae1   :  { %v2633_v22 = vmul.f32 1.442695, %v2630_v30  ;;  %3598 = vmatprep.subr.mxu0 %v3911_v12 }
 0xae2   :  { %v2889_v20 = vpop.permute.xlu0 %2888 }
 0xae3   :  { %3671 = vpow2.f32 %v2633_v22  ;;  %3591 = vmatmul.mubr.msk.f32.vlgmr.msra.gmra.mxu0 %vm408_vm2, %v2809_v19 }
 0xae4   :  { %3600 = vmatprep.mubr.msk.f32.mxu0 %vm3912_vm1, %v3911_v12 }
 0xae6   :  { %v2887_v33 = vpop.permute.xlu0 %2886 }
 0xaf0   :  { %v3672_v32 = vpop.eup %3671 }
 0xaf1   :  { %3586 = vmatmul.mubr.msk.f32.vlgmr.msra.gmra.mxu1 %vm565_vm4, %v3672_v32  ;;  %v2638_v5 = vsel %vm565_vm4, %v3672_v32, 0.0 }
 0xaf2   :  { %3594 = vmatpush3.xpose.msk.msra.mxu1 %vm408_vm2, %v2889_v20  ;;  %3595 = vmatprep.mubr.msk.f32.mxu1 %vm3912_vm1, %v3911_v12 }
 0xaf3   :  { %3603 = vmatprep.subr.mxu1 %v3911_v12 }
 0xaf5   :  { %3596 = vmatmul.mubr.msk.f32.vlgmr.msra.gmra.mxu1 %vm408_vm2, %v2887_v33 }
 0xaf6   :  { %3605 = vmatprep.mubr.msk.f32.mxu1 %vm3912_vm1, %v3911_v12 }
 0xb9f   :  { %v4373_v34 = vpop.f32.mrf.mxu0 }
 0xba1   :  { %v3582_v35 = vpop.f32.mrf.mxu0 }
 0xba3   :  { %v2882_v38 = vpop.f32.mrf.mxu0 }
 0xba4   :  { %v2964_v41 = vsel %vm406_vm3, %v2882_v38, -1e+20 }
 0xba5   :  { %v2966_v43 = vmul.f32 0.17677669, %v2964_v41  ;;  %v3592_v21 = vpop.f32.mrf.mxu0 }
 0xba7   :  { %v2968_v44 = vsel %vm565_vm4, %v2966_v43, -inf }
 0xba8   :  { %2969 = vmax.xlane.f32.xlu1 %v2968_v44 }
 0xbb1   :  { %v4378_v45 = vpop.f32.mrf.mxu1 }
 0xbb3   :  { %v3587_v46 = vpop.f32.mrf.mxu1 }
 0xbb5   :  { %v2960_v47 = vpop.f32.mrf.mxu1 }
 0xbb6   :  { %v2965_v51 = vsel %vm407_vm5, %v2960_v47, -1e+20 }
 0xbb7   :  { %v2967_v12 = vmul.f32 0.17677669, %v2965_v51  ;;  %v3597_v56 = vpop.f32.mrf.mxu1 }
 0xbb9   :  { %3062 = vrot.lane.b32.xlu1 %v4079_v36, %s3919_s28  ;;  %v2971_v24 = vsel %vm565_vm4, %v2967_v12, -inf  ;;  %v1948_v36 = vsel %vm565_vm4, %v4283_v3, 0.0  ;;  %v1945_v3 = vsel %vm565_vm4, %v4271_v58, 0.0 }
 0xbba   :  { %2972 = vmax.xlane.f32.xlu0 %v2971_v24 }
 0xbd0   :  { %2986 = vrot.lane.b32.xlu0 %v4081_v37, %s3919_s28  ;;  %v911_v37 = vsel %vm565_vm4, %v4145_v14, 0.0  ;;  %v2635_v14 = vsel %vm565_vm4, %v3670_v26, 0.0 }
 0xbdd   :  { %909 = vadd.xlane.f32.xlu1 %v908_v59 }
 0xbe1   :  { %1259 = vadd.xlane.f32.xlu1 %v1258_v60 }
 0xbe5   :  { %1604 = vadd.xlane.f32.xlu1 %v1603_v25 }
 0xbe9   :  { %1949 = vadd.xlane.f32.xlu1 %v1948_v36 }
 0xbed   :  { %2294 = vadd.xlane.f32.xlu1 %v2293_v61 }
 0xbef   :  { %912 = vadd.xlane.f32.xlu0 %v911_v37 }
 0xbf1   :  { %2639 = vadd.xlane.f32.xlu1 %v2638_v5 }
 0xbf3   :  { %1256 = vadd.xlane.f32.xlu0 %v1255_v52 }
 0xbf7   :  { %1601 = vadd.xlane.f32.xlu0 %v1600_v28 }
 0xbfb   :  { %1946 = vadd.xlane.f32.xlu0 %v1945_v3 }
 0xbff   :  { %2291 = vadd.xlane.f32.xlu0 %v2290_v50 }
 0xc03   :  { %2636 = vadd.xlane.f32.xlu0 %v2635_v14 }
 0xc31   :  { %v2970_v62 = vpop.xlane.xlu1 %2969 }
 0xc32   :  { %v2974_v0 = vsub.f32 %v2966_v43, %v2970_v62 }
 0xc34   :  { %v2976_v2 = vmul.f32 1.442695, %v2974_v0 }
 0xc35   :  { %v3063_v42 = vpop.permute.xlu1 %3062 }
 0xc36   :  { %3673 = vpow2.f32 %v2976_v2  ;;  %3604 = vmatpush3.msra.mxu1 %v3063_v42 }
 0xc43   :  { %v3674_v4 = vpop.eup %3673  ;;  %v2973_v11 = vpop.xlane.xlu0 %2972 }
 0xc44   :  { %v2975_v7 = vsub.f32 %v2967_v12, %v2973_v11  ;;  %v2980_v8 = vsel %vm565_vm4, %v3674_v4, 0.0 }
 0xc45   :  { %2981 = vadd.xlane.f32.xlu0 %v2980_v8 }
 0xc46   :  { %v2978_v58 = vmul.f32 1.442695, %v2975_v7 }
 0xc47   :  { %v2987_v9 = vpop.permute.xlu0 %2986 }
 0xc48   :  { %3675 = vpow2.f32 %v2978_v58  ;;  %3599 = vmatpush3.msra.mxu0 %v2987_v9  ;;  %v3158_v9 = vld [vmem:[#allocation15 + $0x18] sm:$0xff] }
 0xc49   :  { %579 = vadd.xlane.f32.xlu0 %v578_v39  ;;  %3601 = vmatmul.mubr.msk.f32.vlgmr.msra.gmra.mxu0 %vm565_vm4, %v3674_v4  ;;  %v3157_v39 = vld [vmem:[#allocation15 + $0x10] sm:$0xff] }
 0xc4a   :  { %3608 = vmatprep.subr.mxu0 %v3158_v9 }
 0xc4b   :  { %3609 = vmatpush3.msra.mxu0 %v3158_v9 }
 0xc4c   :  { %3610 = vmatprep.subr.mxu0 %v3157_v39 }
 0xc4d   :  { %3611 = vmatpush3.msra.mxu0 %v3157_v39 }
 0xc55   :  { %v3676_v10 = vpop.eup %3675 }
 0xc56   :  { %3606 = vmatmul.mubr.msk.f32.vlgmr.msra.gmra.mxu1 %vm565_vm4, %v3676_v10  ;;  %v2983_v13 = vsel %vm565_vm4, %v3676_v10, 0.0  ;;  %v3156_v10 = vld [vmem:[#allocation15 + $0x8] sm:$0xff] }
 0xc57   :  { %2984 = vadd.xlane.f32.xlu1 %v2983_v13  ;;  %3612 = vmatprep.subr.mxu0 %v3156_v10 }
 0xc58   :  { %3613 = vmatpush3.msra.mxu0 %v3156_v10 }
 0xc5b   :  { %582 = vadd.xlane.f32.xlu1 %v581_v15  ;;  %v3155_v15 = vld [vmem:[#allocation15] sm:$0xff] }
 0xc5c   :  { %3614 = vmatprep.subr.mxu0 %v3155_v15 }
 0xc5d   :  { %3615 = vmatpush3.msra.mxu0 %v3155_v15 }
 0xc66   :  { %v910_v18 = vpop.xlane.xlu1 %909 }
 0xc67   :  { %3677 = vrcp.f32 %v910_v18 }
 0xc6a   :  { %v1260_v23 = vpop.xlane.xlu1 %1259 }
 0xc6b   :  { %3679 = vrcp.f32 %v1260_v23 }
 0xc6e   :  { %v1605_v26 = vpop.xlane.xlu1 %1604 }
 0xc6f   :  { %3681 = vrcp.f32 %v1605_v26 }
 0xc72   :  { %v1950_v48 = vpop.xlane.xlu1 %1949 }
 0xc73   :  { %3683 = vrcp.f32 %v1950_v48 }
 0xc74   :  { %v3678_v27 = vpop.eup %3677 }
 0xc75   :  { %v1070_v30 = vmul.f32 %v3678_v27, %v4157_v16 }
 0xc76   :  { %v2295_v22 = vpop.xlane.xlu1 %2294 }
 0xc77   :  { %3685 = vrcp.f32 %v2295_v22  ;;  %1074 = vrot.lane.b32.xlu0 %v1070_v30, %s3920_s29 }
 0xc78   :  { %v3680_v19 = vpop.eup %3679  ;;  %v913_v20 = vpop.xlane.xlu0 %912 }
 0xc79   :  { %3687 = vrcp.f32 %v913_v20  ;;  %v1416_v49 = vmul.f32 %v3680_v19, %v4208_v63  ;;  %v3324_v20 = vld [vmem:[%s4464_s8] ss:$0 sm:$0xff] }
 0xc7a   :  { %v2640_v32 = vpop.xlane.xlu1 %2639 }
 0xc7b   :  { %3689 = vrcp.f32 %v2640_v32  ;;  %1421 = vrot.lane.b32.xlu0 %v1416_v49, %s3904_s15 }
 0xc7c   :  { %v3682_v33 = vpop.eup %3681  ;;  %v1257_v35 = vpop.xlane.xlu0 %1256 }
 0xc7d   :  { %3691 = vrcp.f32 %v1257_v35  ;;  %v1761_v38 = vmul.f32 %v3682_v33, %v4254_v40 }
 0xc7f   :  { %1766 = vrot.lane.b32.xlu0 %v1761_v38, %s3921_s30 }
 0xc80   :  { %v3684_v16 = vpop.eup %3683  ;;  %v1602_v41 = vpop.xlane.xlu0 %1601 }
 0xc81   :  { %3693 = vrcp.f32 %v1602_v41  ;;  %v2106_v43 = vmul.f32 %v3684_v16, %v4300_v17 }
 0xc83   :  { %2111 = vrot.lane.b32.xlu0 %v2106_v43, %s3922_s10 }
 0xc84   :  { %v3686_v21 = vpop.eup %3685  ;;  %v1947_v63 = vpop.xlane.xlu0 %1946 }
 0xc85   :  { %3695 = vrcp.f32 %v1947_v63  ;;  %v2451_v44 = vmul.f32 %v3686_v21, %v4346_v1 }
 0xc86   :  { %v3688_v46 = vpop.eup %3687 }
 0xc87   :  { %2456 = vrot.lane.b32.xlu0 %v2451_v44, %s3923_s11  ;;  %v1071_v47 = vmul.f32 %v3688_v46, %v4162_v29 }
 0xc88   :  { %v3690_v40 = vpop.eup %3689  ;;  %v2292_v51 = vpop.xlane.xlu0 %2291 }
 0xc89   :  { %3697 = vrcp.f32 %v2292_v51  ;;  %1076 = vrot.lane.b32.xlu1 %v1071_v47, %s3920_s29  ;;  %v2796_v12 = vmul.f32 %v3690_v40, %v4378_v45 }
 0xc8a   :  { %v3692_v17 = vpop.eup %3691 }
 0xc8b   :  { %2801 = vrot.lane.b32.xlu0 %v2796_v12, %s3924_s5  ;;  %v1415_v56 = vmul.f32 %v3692_v17, %v4203_v54 }
 0xc8c   :  { %v2637_v24 = vpop.xlane.xlu0 %2636 }
 0xc8d   :  { %3699 = vrcp.f32 %v2637_v24  ;;  %1419 = vrot.lane.b32.xlu1 %v1415_v56, %s3904_s15 }
 0xc8e   :  { %v3694_v1 = vpop.eup %3693 }
 0xc8f   :  { %v1760_v59 = vmul.f32 %v3694_v1, %v4249_v31 }
 0xc91   :  { %1764 = vrot.lane.b32.xlu1 %v1760_v59, %s3921_s30 }
 0xc92   :  { %v3696_v29 = vpop.eup %3695 }
 0xc93   :  { %v2105_v60 = vmul.f32 %v3696_v29, %v4295_v6 }
 0xc95   :  { %2109 = vrot.lane.b32.xlu1 %v2105_v60, %s3922_s10 }
 0xc96   :  { %v3698_v25 = vpop.eup %3697 }
 0xc97   :  { %v2450_v45 = vmul.f32 %v3698_v25, %v4341_v53 }
 0xc99   :  { %2454 = vrot.lane.b32.xlu1 %v2450_v45, %s3923_s11 }
 0xc9a   :  { %v3700_v36 = vpop.eup %3699 }
 0xc9b   :  { %v2795_v61 = vmul.f32 %v3700_v36, %v4373_v34 }
 0xc9d   :  { %2799 = vrot.lane.b32.xlu1 %v2795_v61, %s3924_s5 }
 0xcce   :  { %v2982_v54 = vpop.xlane.xlu0 %2981 }
 0xcd2   :  { %v580_v37 = vpop.xlane.xlu0 %579 }
 0xcd3   :  { %3701 = vrcp.f32 %v580_v37 }
 0xce0   :  { %v3702_v5 = vpop.eup %3701  ;;  %v2985_v52 = vpop.xlane.xlu1 %2984 }
 0xce1   :  { %v732_v31 = vmul.f32 %v3702_v5, %v4115_v55 }
 0xce3   :  { %734 = vst.msk [vmem:[#allocation2] sm:$0xff] %vm408_vm2, %v732_v31 }
 0xce4   :  { %v583_v28 = vpop.xlane.xlu1 %582 }
 0xce5   :  { %3703 = vrcp.f32 %v583_v28 }
 0xce6   :  { %3705 = vrcp.f32 %v2982_v54 }
 0xce7   :  { %3707 = vrcp.f32 %v2985_v52 }
 0xce9   :  { %v1075_v6 = vpop.permute.xlu0 %1074 }
 0xcea   :  { %1081 = vst.msk [vmem:[#allocation2] sm:$0xff] %vm1080_vm6, %v1075_v6 }
 0xced   :  { %v1422_v53 = vpop.permute.xlu0 %1421 }
 0xcf1   :  { %v1767_v3 = vpop.permute.xlu0 %1766 }
 0xcf2   :  { %v3704_v50 = vpop.eup %3703 }
 0xcf3   :  { %v733_v34 = vmul.f32 %v3704_v50, %v4117_v57  ;;  %v3706_v4 = vpop.eup %3705 }
 0xcf4   :  { %v3708_v18 = vpop.eup %3707 }
 0xcf5   :  { %v2112_v14 = vpop.permute.xlu0 %2111  ;;  %735 = vst.msk [vmem:[#allocation2 + $0x8] sm:$0xff] %vm408_vm2, %v733_v34 }
 0xcf9   :  { %v2457_v62 = vpop.permute.xlu0 %2456 }
 0xcfb   :  { %v1077_v0 = vpop.permute.xlu1 %1076 }
 0xcfc   :  { %1082 = vst.msk [vmem:[#allocation2 + $0x8] sm:$0xff] %vm1080_vm6, %v1077_v0 }
 0xcfd   :  { %1427 = vst.msk [vmem:[#allocation2 + $0x8] sm:$0xff] %vm1425_vm7, %v1422_v53  ;;  %v2802_v57 = vpop.permute.xlu0 %2801 }
 0xcfe   :  { %1772 = vst.msk [vmem:[#allocation2 + $0x8] sm:$0xff] %vm1770_vm8, %v1767_v3 }
 0xcff   :  { %2117 = vst.msk [vmem:[#allocation2 + $0x8] sm:$0xff] %vm2115_vm9, %v2112_v14  ;;  %v1420_v55 = vpop.permute.xlu1 %1419 }
 0xd00   :  { %2462 = vst.msk [vmem:[#allocation2 + $0x8] sm:$0xff] %vm2460_vm10, %v2457_v62 }
 0xd01   :  { %1426 = vst.msk [vmem:[#allocation2] sm:$0xff] %vm1425_vm7, %v1420_v55 }
 0xd02   :  { %2807 = vst.msk [vmem:[#allocation2 + $0x8] sm:$0xff] %vm2805_vm11, %v2802_v57 }
 0xd03   :  { %v1765_v2 = vpop.permute.xlu1 %1764 }
 0xd04   :  { %1771 = vst.msk [vmem:[#allocation2] sm:$0xff] %vm1770_vm8, %v1765_v2 }
 0xd07   :  { %v2110_v42 = vpop.permute.xlu1 %2109 }
 0xd08   :  { %2116 = vst.msk [vmem:[#allocation2] sm:$0xff] %vm2115_vm9, %v2110_v42 }
 0xd09   :  { %v3058_v11 = vpop.f32.mrf.mxu0 }
 0xd0a   :  { %v3140_v7 = vmul.f32 %v3706_v4, %v3058_v11 }
 0xd0b   :  { %v3602_v8 = vpop.f32.mrf.mxu0  ;;  %v2455_v58 = vpop.permute.xlu1 %2454 }
 0xd0c   :  { %2461 = vst.msk [vmem:[#allocation2] sm:$0xff] %vm2460_vm10, %v2455_v58  ;;  %3144 = vrot.lane.b32.xlu1 %v3140_v7, %s3925_s12 }
 0xd0f   :  { %v2800_v13 = vpop.permute.xlu1 %2799 }
 0xd10   :  { %2806 = vst.msk [vmem:[#allocation2] sm:$0xff] %vm2805_vm11, %v2800_v13 }
 0xd16   :  { %v3134_v23 = vpop.f32.mrf.mxu1 }
 0xd17   :  { %v3141_v26 = vmul.f32 %v3708_v18, %v3134_v23 }
 0xd18   :  { %v3607_v48 = vpop.f32.mrf.mxu1 }
 0xd19   :  { %3146 = vrot.lane.b32.xlu0 %v3141_v26, %s3925_s12 }
 0xd7e   :  { %v3145_v27 = vpop.permute.xlu1 %3144 }
 0xd7f   :  { %3151 = vst.msk [vmem:[#allocation2] sm:$0xff] %vm3150_vm12, %v3145_v27 }
 0xd86   :  { %v3153_v30 = vld [vmem:[#allocation2] sm:$0xff] }
 0xd87   :  { %3616 = vmatprep.mubr.msk.f32.mxu0 %vm152_vm0, %v3153_v30 }
 0xd8b   :  { %v3147_v22 = vpop.permute.xlu0 %3146 }
 0xd8c   :  { %3152 = vst.msk [vmem:[#allocation2 + $0x8] sm:$0xff] %vm3150_vm12, %v3147_v22 }
 0xd93   :  { %v3154_v19 = vld [vmem:[#allocation2 + $0x8] sm:$0xff] }
 0xd94   :  { %3617 = vmatmul.mubr.msk.f32.vlgmr.msra.gmra.mxu0 %vm152_vm0, %v3154_v19 }
 0xe54   :  { %v3618_v49 = vpop.f32.mrf.mxu0 }
 0xe55   :  { %v3244_v32 = vadd.f32 %v3618_v49, %v3324_v20 }
 0xe56   :  { %v3238_v33 = vpop.f32.mrf.mxu0 }
 0xe57   :  { %3248 = vst.msk [vmem:[#allocation17 + $0x8] sm:$0xff] %vm152_vm0, %v3244_v32  ;;  %v3239_v35 = vadd.f32 %v3324_v20, %v3238_v33 }
 0xe59   :  { %3247 = vst.msk [vmem:[#allocation17] sm:$0xff] %vm152_vm0, %v3239_v35 }
 0xe5a   :  { %3880 = shalt.err (!%p3877_p2)
}
 0xe5b   :  { %3260 = dma.vmem_to_hbm [thread:$0]  %s3255_s17, 256, %s4465_s9, [#allocation5], %s3903_s14, %s3903_s14, %s3904_s15  }
 0xe5c   :  { %3899 = dma.done.wait [#allocation5], 256  }
 0xe5d   :  { %3900 = vsyncadd [#allocation5], 4294967040 }
 0xe5e   :  { %3264 = vsyncpa [#allocation4], 1 }
 0xe5f   :  { %3265 = vsyncpa [#allocation7], 1 }
 0xe60   :  { %3266 = vsyncpa [#allocation10], 1 }
 0xe61   :  { %3267 = vsyncpa [#allocation13], 1 }
 0xe62   :  { %3268 = vsyncpa [#allocation16], 1 }
 0xe63   :  { %3269 = vsyncpa [#allocation5], 1 }

</bundles_post_ra>
